<compile_context>
chip_gen: v6e
topology: v6e:2x2x1
jax: 0.10.0
libtpu: 0.0.40
codegen_flags: <defaults>
</compile_context>

<pallas_src>
import functools

import jax
import jax.numpy as jnp
from jax.experimental import pallas as pl
from jax.experimental.pallas import tpu as pltpu  # noqa: F401  (TPU backend)

NEG_SLOPE = 0.2   # LeakyReLU slope used by ConvNormRelu(leaky=True)
BN_EPS = 1e-5


# ----------------------------------------------------------------------------
# Fused kernel: proj (1x1) -> Res_CNR_Stack(L) -> fused [proj_2 | proj_1] head
# ----------------------------------------------------------------------------
def _frame_enc_kernel(x_ref, wp_ref, bp_ref, wenc_ref, benc_ref, wq_ref, bq_ref,
                      out_ref, *, seq):
    T = seq
    BT = x_ref.shape[0]
    B = BT // T
    H = wp_ref.shape[1]
    L = wenc_ref.shape[0]
    cdt = wp_ref.dtype                        # bf16 compute dtype for the MXU

    # ---- proj: 1x1 Conv1d == channel matmul (batch folded into M) ----------
    a = (jnp.dot(x_ref[...].astype(cdt), wp_ref[...],
                 preferred_element_type=jnp.float32) + bp_ref[...])      # (BT, H) f32

    # ---- temporal-shift masks (hoisted out of the layer loop) --------------
    # Row r holds (b = r // T, t = r % T); zero the rows where the k=3 conv
    # would read across the zero padding (which is also the batch boundary).
    t_of_row = jax.lax.broadcasted_iota(jnp.int32, (BT, H), 0) % T
    not_first = t_of_row != 0                 # rows with a valid x[t-1]
    not_last = t_of_row != (T - 1)            # rows with a valid x[t+1]

    # ---- enc: L x [conv3 (im2col matmul) + folded eval-BN + id + LeakyReLU] -
    for layer in range(L):
        prev = jnp.where(not_first, jnp.roll(a, 1, axis=0), 0.0)         # x[t-1]
        nxt = jnp.where(not_last, jnp.roll(a, -1, axis=0), 0.0)          # x[t+1]
        cols = jnp.concatenate([prev, a, nxt], axis=1).astype(cdt)       # (BT, 3H)
        y = (jnp.dot(cols, wenc_ref[layer],
                     preferred_element_type=jnp.float32) + benc_ref[layer])
        z = y + a                                                        # identity residual
        a = jnp.where(z > 0, z, NEG_SLOPE * z)                           # LeakyReLU(0.2)

    # ---- heads: ONE K = T*H matmul over the flattened activation -----------
    # Flatten (B, T, H) -> (B, T*H) with flat index t*H + h (wq rows were
    # pre-permuted host-side to this order), realized as T lane-aligned
    # concats; a single matmul then computes proj_2 | proj_1 fused, with the
    # K = T*H contraction accumulated inside the MXU.
    a3 = a.reshape(B, T, H)
    a_flat = jnp.concatenate([a3[:, t, :] for t in range(T)], axis=1).astype(cdt)
    out = (jnp.dot(a_flat, wq_ref[...],
                   preferred_element_type=jnp.float32) + bq_ref[...])    # (B, 3H)
    out_ref[...] = out.astype(out_ref.dtype)


# ----------------------------------------------------------------------------
# Host-side parameter preparation (BN fold, im2col weights, head fusion, bf16)
# ----------------------------------------------------------------------------
def prepare_frame_enc_params(params, seq_len, compute_dtype=jnp.bfloat16):
    """Fold eval-BN into the conv weights, build im2col / fused-head weights,
    and cast all matmul weights to `compute_dtype` (biases stay f32)."""
    H = params["proj"]["w"].shape[1]
    T = seq_len

    # proj (1x1 conv)
    wp = params["proj"]["w"].astype(compute_dtype)                 # (in_dim, H)
    bp = params["proj"]["b"].reshape(1, H).astype(jnp.float32)

    # enc: fold eval BatchNorm into conv weight/bias; build im2col weights.
    wenc, benc = [], []
    for p in params["enc"]:
        scale = p["gamma"] / jnp.sqrt(p["var"] + BN_EPS)           # (1, H) per-Cout
        shift = p["beta"] - p["mean"] * scale
        w_eff = (p["w"] * scale.reshape(1, 1, H)).reshape(3 * H, H)  # rows = k*H + ci
        b_eff = p["b"] * scale + shift
        wenc.append(w_eff.astype(compute_dtype))
        benc.append(b_eff.astype(jnp.float32))
    wenc = jnp.stack(wenc, axis=0)                                 # (L, 3H, H)
    benc = jnp.stack(benc, axis=0)                                 # (L, 1, H)

    # heads: concat proj_2 | proj_1 along Cout, then rearrange the H*T input
    # rows from PyTorch order (h*T + t) to kernel flatten order (t*H + h).
    w2, b2 = params["proj_2"]["w"], params["proj_2"]["b"]          # (H*T, 2H), (1, 2H)
    w1, b1 = params["proj_1"]["w"], params["proj_1"]["b"]          # (H*T,  H), (1,  H)
    assert w2.shape[0] == H * T and w1.shape[0] == H * T, \
        "Frame_Enc requires num_hiddens * T == 1024"
    wcat = jnp.concatenate([w2, w1], axis=1)                       # (H*T, 3H)
    bq = jnp.concatenate([b2, b1], axis=1).reshape(1, 3 * H).astype(jnp.float32)
    wq = (wcat.reshape(H, T, 3 * H).transpose(1, 0, 2)
              .reshape(T * H, 3 * H).astype(compute_dtype))        # (T*H, 3H)

    return {"wp": wp, "bp": bp, "wenc": wenc, "benc": benc, "wq": wq, "bq": bq}


# ----------------------------------------------------------------------------
# Forward (matches PyTorch Frame_Enc.forward) -- single fused pallas_call
# ----------------------------------------------------------------------------
def frame_enc_forward_channels_last(prep, x_tlast):
    """x_tlast: (B, T, in_dim) channels-last.  Preferred entry point: producers
    that already have time-major activations avoid the NCT->NTC transpose."""
    B, T, in_dim = x_tlast.shape
    H = prep["bp"].shape[1]
    x2 = x_tlast.reshape(B * T, in_dim)        # row = b*T + t (kernel invariant)

    out_cat = pl.pallas_call(
        functools.partial(_frame_enc_kernel, seq=T),
        out_shape=jax.ShapeDtypeStruct((B, 3 * H), jnp.float32),
    )(x2, prep["wp"], prep["bp"], prep["wenc"], prep["benc"], prep["wq"], prep["bq"])

    second_last = out_cat[:, :2 * H].reshape(B, 2 * H, 1)          # proj_2 output
    last = out_cat[:, 2 * H:].reshape(B, H, 1)                     # proj_1 output
    return second_last, last


def frame_enc_forward(prep, x):
    """x: (B, in_dim, T) PyTorch NCT layout.
    Returns (second_last, last) == ((B, 2*num_hiddens, 1), (B, num_hiddens, 1))."""
    return frame_enc_forward_channels_last(prep, jnp.transpose(x, (0, 2, 1)))


# ----------------------------------------------------------------------------
# Deterministic synthetic parameters (math layout; no checkpoint)
# ----------------------------------------------------------------------------
class _KeyGen:
    def __init__(self, key):
        self._key = key

    def __call__(self):
        self._key, sub = jax.random.split(self._key)
        return sub


def init_frame_enc_params(key, in_dim, num_hiddens):
    H = num_hiddens
    kg = _KeyGen(key)

    def conv1x1(cin, cout):
        return {"w": 0.05 * jax.random.normal(kg(), (cin, cout), jnp.float32),
                "b": 0.05 * jax.random.normal(kg(), (1, cout), jnp.float32)}

    def cnr(C):
        return {"w": 0.05 * jax.random.normal(kg(), (3, C, C), jnp.float32),
                "b": 0.05 * jax.random.normal(kg(), (1, C), jnp.float32),
                "gamma": 1.0 + 0.1 * jax.random.normal(kg(), (1, C), jnp.float32),
                "beta": 0.1 * jax.random.normal(kg(), (1, C), jnp.float32),
                "mean": 0.05 * jax.random.normal(kg(), (1, C), jnp.float32),
                "var": 1.0 + 0.1 * jnp.abs(jax.random.normal(kg(), (1, C), jnp.float32))}

    return {"proj": conv1x1(in_dim, H),
            "enc": [cnr(H) for _ in range(2)],
            "proj_1": conv1x1(256 * 4, H),
            "proj_2": conv1x1(256 * 4, 2 * H)}


# ----------------------------------------------------------------------------
# Pure-JAX (XLA, all-f32) reference with PyTorch Frame_Enc semantics
# ----------------------------------------------------------------------------
def frame_enc_reference(params, x):
    B, _, T = x.shape
    H = params["proj"]["w"].shape[1]
    a = (jnp.einsum("bct,co->bot", x, params["proj"]["w"], precision="highest")
         + params["proj"]["b"].reshape(1, H, 1))
    for p in params["enc"]:
        xp = jnp.pad(a, ((0, 0), (0, 0), (1, 1)))
        conv = sum(jnp.einsum("bct,co->bot", xp[:, :, k:k + T], p["w"][k],
                              precision="highest") for k in range(3))
        conv = conv + p["b"].reshape(1, H, 1)
        scale = p["gamma"] / jnp.sqrt(p["var"] + BN_EPS)
        shift = p["beta"] - p["mean"] * scale
        z = conv * scale.reshape(1, H, 1) + shift.reshape(1, H, 1) + a
        a = jnp.where(z > 0, z, NEG_SLOPE * z)
    flat = a.reshape(B, H * T)                                    # PyTorch reshape: h-major
    second_last = (jnp.dot(flat, params["proj_2"]["w"], precision="highest")
                   + params["proj_2"]["b"]).reshape(B, 2 * H, 1)
    last = (jnp.dot(flat, params["proj_1"]["w"], precision="highest")
            + params["proj_1"]["b"]).reshape(B, H, 1)
    return second_last, last


if __name__ == "__main__":
    in_dim = 64
    num_hiddens = 128
    T = (256 * 4) // num_hiddens            # Frame_Enc requires num_hiddens * T == 1024
    assert num_hiddens * T == 256 * 4

    key = jax.random.PRNGKey(0)
    pkey, xkey, xbkey = jax.random.split(key, 3)
    params = init_frame_enc_params(pkey, in_dim, num_hiddens)
    prep = prepare_frame_enc_params(params, T)
    fwd = jax.jit(frame_enc_forward)

    def run_and_check(x, tag):
        second_last, last = fwd(prep, x)
        second_last = jax.block_until_ready(second_last)
        last = jax.block_until_ready(last)
        B = x.shape[0]
        assert second_last.shape == (B, 2 * num_hiddens, 1), second_last.shape
        assert last.shape == (B, num_hiddens, 1), last.shape
        assert bool(jnp.all(jnp.isfinite(second_last)))
        assert bool(jnp.all(jnp.isfinite(last)))
        ref_sl, ref_l = frame_enc_reference(params, x)
        # bf16 weights/operands with f32 accumulation vs. the all-f32 reference;
        # layout / permutation bugs would produce O(1) errors and still be caught.
        assert bool(jnp.allclose(second_last, ref_sl, rtol=3e-2, atol=3e-2)), \
            (tag, float(jnp.max(jnp.abs(second_last - ref_sl))))
        assert bool(jnp.allclose(last, ref_l, rtol=3e-2, atol=3e-2)), \
            (tag, float(jnp.max(jnp.abs(last - ref_l))))

    # Spec-sized example (B=2, in_dim=64, T=8).
    x_small = jax.random.normal(xkey, (2, in_dim, T), dtype=jnp.float32)
    run_and_check(x_small, "B=2")

    # Review's batching lever: fold more frames per call (row = b*T + t invariant
    # preserved) so M approaches the MXU height and the weight DMA is amortized.
    x_batched = jax.random.normal(xbkey, (16, in_dim, T), dtype=jnp.float32)
    run_and_check(x_batched, "B=16")

    print("KERNEL_OK")
</pallas_src>

<mosaic_0001>
module attributes {stable_mosaic.version = 11 : i64} {
  func.func @_frame_enc_kernel(%arg0: memref<16x64xf32, #tpu.memory_space<vmem>>, %arg1: memref<64x128xbf16, #tpu.memory_space<vmem>>, %arg2: memref<1x128xf32, #tpu.memory_space<vmem>>, %arg3: memref<2x384x128xbf16, #tpu.memory_space<vmem>>, %arg4: memref<2x1x128xf32, #tpu.memory_space<vmem>>, %arg5: memref<1024x384xbf16, #tpu.memory_space<vmem>>, %arg6: memref<1x384xf32, #tpu.memory_space<vmem>>, %arg7: memref<2x384xf32, #tpu.memory_space<vmem>>) attributes {dimension_semantics = [], scalar_prefetch = 0 : i64, scratch_operands = 0 : i64, tpu.core_type = #tpu.core_type<tc>} {
    %c0 = arith.constant 0 : index
    %c0_0 = arith.constant 0 : index
    %0 = vector.load %arg0[%c0, %c0_0] : memref<16x64xf32, #tpu.memory_space<vmem>>, vector<16x64xf32>
    %1 = arith.truncf %0 : vector<16x64xf32> to vector<16x64xbf16>
    %c0_1 = arith.constant 0 : index
    %c0_2 = arith.constant 0 : index
    %2 = vector.load %arg1[%c0_1, %c0_2] : memref<64x128xbf16, #tpu.memory_space<vmem>>, vector<64x128xbf16>
    %cst = arith.constant dense<0.000000e+00> : vector<16x128xf32>
    %3 = tpu.matmul %1, %2, %cst {dimension_numbers = #tpu.dot_dimension_numbers<[1], [0], [0], [1], [0, 0, 1, 1], [], []>} : vector<16x64xbf16>, vector<64x128xbf16>, vector<16x128xf32> -> vector<16x128xf32>
    %c0_3 = arith.constant 0 : index
    %c0_4 = arith.constant 0 : index
    %4 = vector.load %arg2[%c0_3, %c0_4] : memref<1x128xf32, #tpu.memory_space<vmem>>, vector<1x128xf32>
    %5 = vector.broadcast %4 : vector<1x128xf32> to vector<16x128xf32>
    %6 = arith.addf %3, %5 : vector<16x128xf32>
    %7 = tpu.iota {dimensions = array<i32: 0>} : vector<16x128xi32>
    %c8_i32 = arith.constant 8 : i32
    %c0_i32 = arith.constant 0 : i32
    %8 = arith.cmpi eq, %c8_i32, %c0_i32 : i32
    %c1_i32 = arith.constant 1 : i32
    %9 = arith.select %8, %c1_i32, %c8_i32 : i32
    %10 = vector.broadcast %9 : i32 to vector<16x128xi32>
    %11 = arith.remsi %7, %10 : vector<16x128xi32>
    %c0_i32_5 = arith.constant 0 : i32
    %12 = vector.broadcast %c0_i32_5 : i32 to vector<16x128xi32>
    %13 = arith.cmpi ne, %11, %12 : vector<16x128xi32>
    %c0_i32_6 = arith.constant 0 : i32
    %14 = vector.broadcast %c0_i32_6 : i32 to vector<16x128xi32>
    %15 = arith.cmpi slt, %11, %14 : vector<16x128xi32>
    %c0_i32_7 = arith.constant 0 : i32
    %16 = arith.cmpi slt, %9, %c0_i32_7 : i32
    %17 = vector.broadcast %16 : i1 to vector<16x128xi1>
    %18 = vector.broadcast %17 : vector<16x128xi1> to vector<16x128xi1>
    %19 = arith.xori %15, %18 : vector<16x128xi1>
    %20 = arith.andi %19, %13 : vector<16x128xi1>
    %21 = vector.broadcast %9 : i32 to vector<16x128xi32>
    %22 = arith.addi %11, %21 : vector<16x128xi32>
    %23 = arith.select %20, %22, %11 : vector<16x128xi1>, vector<16x128xi32>
    %c0_i32_8 = arith.constant 0 : i32
    %24 = vector.broadcast %c0_i32_8 : i32 to vector<16x128xi32>
    %25 = arith.cmpi ne, %23, %24 : vector<16x128xi32>
    %c7_i32 = arith.constant 7 : i32
    %26 = vector.broadcast %c7_i32 : i32 to vector<16x128xi32>
    %27 = arith.cmpi ne, %23, %26 : vector<16x128xi32>
    %28 = vector.extract_strided_slice %6 {offsets = [15, 0], sizes = [1, 128], strides = [1, 1]} : vector<16x128xf32> to vector<1x128xf32>
    %29 = vector.extract_strided_slice %6 {offsets = [0, 0], sizes = [15, 128], strides = [1, 1]} : vector<16x128xf32> to vector<15x128xf32>
    %30 = tpu.concatenate %28, %29 in 0 : vector<1x128xf32>, vector<15x128xf32> -> vector<16x128xf32>
    %cst_9 = arith.constant 0.000000e+00 : f32
    %31 = vector.broadcast %cst_9 : f32 to vector<16x128xf32>
    %32 = arith.select %25, %30, %31 : vector<16x128xi1>, vector<16x128xf32>
    %33 = vector.extract_strided_slice %6 {offsets = [1, 0], sizes = [15, 128], strides = [1, 1]} : vector<16x128xf32> to vector<15x128xf32>
    %34 = vector.extract_strided_slice %6 {offsets = [0, 0], sizes = [1, 128], strides = [1, 1]} : vector<16x128xf32> to vector<1x128xf32>
    %35 = tpu.concatenate %33, %34 in 0 : vector<15x128xf32>, vector<1x128xf32> -> vector<16x128xf32>
    %cst_10 = arith.constant 0.000000e+00 : f32
    %36 = vector.broadcast %cst_10 : f32 to vector<16x128xf32>
    %37 = arith.select %27, %35, %36 : vector<16x128xi1>, vector<16x128xf32>
    %38 = tpu.concatenate %32, %6, %37 in 1 : vector<16x128xf32>, vector<16x128xf32>, vector<16x128xf32> -> vector<16x384xf32>
    %39 = arith.truncf %38 : vector<16x384xf32> to vector<16x384xbf16>
    %c0_11 = arith.constant 0 : index
    %c0_12 = arith.constant 0 : index
    %c0_13 = arith.constant 0 : index
    %40 = vector.load %arg3[%c0_11, %c0_12, %c0_13] : memref<2x384x128xbf16, #tpu.memory_space<vmem>>, vector<1x384x128xbf16>
    %41 = vector.shape_cast %40 : vector<1x384x128xbf16> to vector<384x128xbf16>
    %cst_14 = arith.constant dense<0.000000e+00> : vector<16x128xf32>
    %42 = tpu.matmul %39, %41, %cst_14 {dimension_numbers = #tpu.dot_dimension_numbers<[1], [0], [0], [1], [0, 0, 1, 1], [], []>} : vector<16x384xbf16>, vector<384x128xbf16>, vector<16x128xf32> -> vector<16x128xf32>
    %c0_15 = arith.constant 0 : index
    %c0_16 = arith.constant 0 : index
    %c0_17 = arith.constant 0 : index
    %43 = vector.load %arg4[%c0_15, %c0_16, %c0_17] : memref<2x1x128xf32, #tpu.memory_space<vmem>>, vector<1x1x128xf32>
    %44 = vector.shape_cast %43 : vector<1x1x128xf32> to vector<1x128xf32>
    %45 = vector.broadcast %44 : vector<1x128xf32> to vector<16x128xf32>
    %46 = arith.addf %42, %45 : vector<16x128xf32>
    %47 = arith.addf %46, %6 : vector<16x128xf32>
    %cst_18 = arith.constant 0.000000e+00 : f32
    %48 = vector.broadcast %cst_18 : f32 to vector<16x128xf32>
    %49 = arith.cmpf ogt, %47, %48 : vector<16x128xf32>
    %cst_19 = arith.constant 2.000000e-01 : f32
    %50 = vector.broadcast %cst_19 : f32 to vector<16x128xf32>
    %51 = arith.mulf %50, %47 : vector<16x128xf32>
    %52 = arith.select %49, %47, %51 : vector<16x128xi1>, vector<16x128xf32>
    %53 = vector.extract_strided_slice %52 {offsets = [15, 0], sizes = [1, 128], strides = [1, 1]} : vector<16x128xf32> to vector<1x128xf32>
    %54 = vector.extract_strided_slice %52 {offsets = [0, 0], sizes = [15, 128], strides = [1, 1]} : vector<16x128xf32> to vector<15x128xf32>
    %55 = tpu.concatenate %53, %54 in 0 : vector<1x128xf32>, vector<15x128xf32> -> vector<16x128xf32>
    %cst_20 = arith.constant 0.000000e+00 : f32
    %56 = vector.broadcast %cst_20 : f32 to vector<16x128xf32>
    %57 = arith.select %25, %55, %56 : vector<16x128xi1>, vector<16x128xf32>
    %58 = vector.extract_strided_slice %52 {offsets = [1, 0], sizes = [15, 128], strides = [1, 1]} : vector<16x128xf32> to vector<15x128xf32>
    %59 = vector.extract_strided_slice %52 {offsets = [0, 0], sizes = [1, 128], strides = [1, 1]} : vector<16x128xf32> to vector<1x128xf32>
    %60 = tpu.concatenate %58, %59 in 0 : vector<15x128xf32>, vector<1x128xf32> -> vector<16x128xf32>
    %cst_21 = arith.constant 0.000000e+00 : f32
    %61 = vector.broadcast %cst_21 : f32 to vector<16x128xf32>
    %62 = arith.select %27, %60, %61 : vector<16x128xi1>, vector<16x128xf32>
    %63 = tpu.concatenate %57, %52, %62 in 1 : vector<16x128xf32>, vector<16x128xf32>, vector<16x128xf32> -> vector<16x384xf32>
    %64 = arith.truncf %63 : vector<16x384xf32> to vector<16x384xbf16>
    %c1 = arith.constant 1 : index
    %c0_22 = arith.constant 0 : index
    %c0_23 = arith.constant 0 : index
    %65 = vector.load %arg3[%c1, %c0_22, %c0_23] : memref<2x384x128xbf16, #tpu.memory_space<vmem>>, vector<1x384x128xbf16>
    %66 = vector.shape_cast %65 : vector<1x384x128xbf16> to vector<384x128xbf16>
    %cst_24 = arith.constant dense<0.000000e+00> : vector<16x128xf32>
    %67 = tpu.matmul %64, %66, %cst_24 {dimension_numbers = #tpu.dot_dimension_numbers<[1], [0], [0], [1], [0, 0, 1, 1], [], []>} : vector<16x384xbf16>, vector<384x128xbf16>, vector<16x128xf32> -> vector<16x128xf32>
    %c1_25 = arith.constant 1 : index
    %c0_26 = arith.constant 0 : index
    %c0_27 = arith.constant 0 : index
    %68 = vector.load %arg4[%c1_25, %c0_26, %c0_27] : memref<2x1x128xf32, #tpu.memory_space<vmem>>, vector<1x1x128xf32>
    %69 = vector.shape_cast %68 : vector<1x1x128xf32> to vector<1x128xf32>
    %70 = vector.broadcast %69 : vector<1x128xf32> to vector<16x128xf32>
    %71 = arith.addf %67, %70 : vector<16x128xf32>
    %72 = arith.addf %71, %52 : vector<16x128xf32>
    %cst_28 = arith.constant 0.000000e+00 : f32
    %73 = vector.broadcast %cst_28 : f32 to vector<16x128xf32>
    %74 = arith.cmpf ogt, %72, %73 : vector<16x128xf32>
    %cst_29 = arith.constant 2.000000e-01 : f32
    %75 = vector.broadcast %cst_29 : f32 to vector<16x128xf32>
    %76 = arith.mulf %75, %72 : vector<16x128xf32>
    %77 = arith.select %74, %72, %76 : vector<16x128xi1>, vector<16x128xf32>
    %78 = vector.shape_cast %77 : vector<16x128xf32> to vector<2x8x128xf32>
    %79 = vector.extract_strided_slice %78 {offsets = [0, 0, 0], sizes = [2, 1, 128], strides = [1, 1, 1]} : vector<2x8x128xf32> to vector<2x1x128xf32>
    %80 = vector.shape_cast %79 : vector<2x1x128xf32> to vector<2x128xf32>
    %81 = vector.extract_strided_slice %78 {offsets = [0, 1, 0], sizes = [2, 1, 128], strides = [1, 1, 1]} : vector<2x8x128xf32> to vector<2x1x128xf32>
    %82 = vector.shape_cast %81 : vector<2x1x128xf32> to vector<2x128xf32>
    %83 = vector.extract_strided_slice %78 {offsets = [0, 2, 0], sizes = [2, 1, 128], strides = [1, 1, 1]} : vector<2x8x128xf32> to vector<2x1x128xf32>
    %84 = vector.shape_cast %83 : vector<2x1x128xf32> to vector<2x128xf32>
    %85 = vector.extract_strided_slice %78 {offsets = [0, 3, 0], sizes = [2, 1, 128], strides = [1, 1, 1]} : vector<2x8x128xf32> to vector<2x1x128xf32>
    %86 = vector.shape_cast %85 : vector<2x1x128xf32> to vector<2x128xf32>
    %87 = vector.extract_strided_slice %78 {offsets = [0, 4, 0], sizes = [2, 1, 128], strides = [1, 1, 1]} : vector<2x8x128xf32> to vector<2x1x128xf32>
    %88 = vector.shape_cast %87 : vector<2x1x128xf32> to vector<2x128xf32>
    %89 = vector.extract_strided_slice %78 {offsets = [0, 5, 0], sizes = [2, 1, 128], strides = [1, 1, 1]} : vector<2x8x128xf32> to vector<2x1x128xf32>
    %90 = vector.shape_cast %89 : vector<2x1x128xf32> to vector<2x128xf32>
    %91 = vector.extract_strided_slice %78 {offsets = [0, 6, 0], sizes = [2, 1, 128], strides = [1, 1, 1]} : vector<2x8x128xf32> to vector<2x1x128xf32>
    %92 = vector.shape_cast %91 : vector<2x1x128xf32> to vector<2x128xf32>
    %93 = vector.extract_strided_slice %78 {offsets = [0, 7, 0], sizes = [2, 1, 128], strides = [1, 1, 1]} : vector<2x8x128xf32> to vector<2x1x128xf32>
    %94 = vector.shape_cast %93 : vector<2x1x128xf32> to vector<2x128xf32>
    %95 = tpu.concatenate %80, %82, %84, %86, %88, %90, %92, %94 in 1 : vector<2x128xf32>, vector<2x128xf32>, vector<2x128xf32>, vector<2x128xf32>, vector<2x128xf32>, vector<2x128xf32>, vector<2x128xf32>, vector<2x128xf32> -> vector<2x1024xf32>
    %96 = arith.truncf %95 : vector<2x1024xf32> to vector<2x1024xbf16>
    %c0_30 = arith.constant 0 : index
    %c0_31 = arith.constant 0 : index
    %97 = vector.load %arg5[%c0_30, %c0_31] : memref<1024x384xbf16, #tpu.memory_space<vmem>>, vector<1024x384xbf16>
    %cst_32 = arith.constant dense<0.000000e+00> : vector<2x384xf32>
    %98 = tpu.matmul %96, %97, %cst_32 {dimension_numbers = #tpu.dot_dimension_numbers<[1], [0], [0], [1], [0, 0, 1, 1], [], []>} : vector<2x1024xbf16>, vector<1024x384xbf16>, vector<2x384xf32> -> vector<2x384xf32>
    %c0_33 = arith.constant 0 : index
    %c0_34 = arith.constant 0 : index
    %99 = vector.load %arg6[%c0_33, %c0_34] : memref<1x384xf32, #tpu.memory_space<vmem>>, vector<1x384xf32>
    %100 = vector.broadcast %99 : vector<1x384xf32> to vector<2x384xf32>
    %101 = arith.addf %98, %100 : vector<2x384xf32>
    %c0_35 = arith.constant 0 : index
    %c0_36 = arith.constant 0 : index
    %102 = vector.load %arg7[%c0_35, %c0_36] : memref<2x384xf32, #tpu.memory_space<vmem>>, vector<2x384xf32>
    tpu.vector_store %arg7[%c0_35, %c0_36], %101 {strides = array<i32>} : memref<2x384xf32, #tpu.memory_space<vmem>>, vector<2x384xf32>,
    return
  }
}

</mosaic_0001>

<bundles_post_ra>
// kernel: frame_enc_forward.1
= control target key start
LH: loop header
LB: loop body
LE: loop exit
PB: predicated region body
PF: predicated region fallthrough
CT: control target
= control target key end

     0   :  { %12 = vsyncpa [#allocation3], 0  ;;  %s3672_s0 = inlined_call_operand.hbm [shape: f32[16,64], index: 0, kind: input, shape index: {}]   ;;  %s3673_s1 = inlined_call_operand.hbm [shape: bf16[64,128], index: 1, kind: input, shape index: {}]   ;;  %s3674_s2 = inlined_call_operand.vmem [shape: f32[1,128], index: 2, kind: input, shape index: {}]   ;;  %s3675_s3 = inlined_call_operand.hbm [shape: bf16[2,384,128], index: 3, kind: input, shape index: {}]   ;;  %s3676_s4 = inlined_call_operand.hbm [shape: f32[2,1,128], index: 4, kind: input, shape index: {}]   ;;  %s3677_s5 = inlined_call_operand.hbm [shape: bf16[1024,384], index: 5, kind: input, shape index: {}]   ;;  %s3678_s6 = inlined_call_operand.vmem [shape: f32[1,384], index: 6, kind: input, shape index: {}]   ;;  %s3679_s7 = inlined_call_operand.vmem [shape: f32[2,384], index: 7, kind: output, shape index: {}]  }
   0x1   :  { %13 = vsyncpa [#allocation5], 0 }
   0x2   :  { %14 = vsyncpa [#allocation8], 0  ;;  %s3428_s24 = smov [#allocation4]  }
   0x3   :  { %s32_s25 = sshll.u32 %s3428_s24, 4  ;;  %s33_s25 = int_to_ptr.vmem [resolvable:$true] %s32_s25 }
   0x4   :  { %s3330_s26 = scalar_lea.vmem %s33_s25, 512  ;;  %p3335_p1 = scmp.lt.s32.totalorder %s33_s25, %s33_s25 }
   0x5   :  { %p3331_p0 = scmp.ne.s32.totalorder %s33_s25, %s3330_s26  ;;  %p3336_p2 = scmp.lt.s32.totalorder %s3330_s26, %s3330_s26 }
   0x7   :  { %p3337_p3 = por %p3336_p2, %p3335_p1 }
   0x9   :  { %p3338_p4 = pnand %p3337_p3, %p3331_p0 }
   0xb   :  { %3341 = shalt.err (!%p3338_p4)
}
   0xc   :  { %s3429_s27 = smov 64   ;;  %s3430_s28 = smov 4  }
   0xd   :  { %38 = dma.hbm_to_vmem [thread:$0]  %s3673_s1, 512, %s33_s25, [#allocation5], %s3429_s27, %s3429_s27, %s3430_s28  }
   0xe   :  { %s3431_s8 = smov [#allocation7]  }
   0xf   :  { %s58_s9 = sshll.u32 %s3431_s8, 4  ;;  %s59_s9 = int_to_ptr.vmem [resolvable:$true] %s58_s9 }
  0x10   :  { %s3350_s10 = scalar_lea.vmem %s59_s9, 32  ;;  %p3355_p6 = scmp.lt.s32.totalorder %s59_s9, %s59_s9 }
  0x11   :  { %p3351_p5 = scmp.ne.s32.totalorder %s59_s9, %s3350_s10  ;;  %p3356_p7 = scmp.lt.s32.totalorder %s3350_s10, %s3350_s10 }
  0x13   :  { %p3357_p8 = por %p3356_p7, %p3355_p6 }
  0x15   :  { %p3358_p9 = pnand %p3357_p8, %p3351_p5 }
  0x17   :  { %3361 = shalt.err (!%p3358_p9)
}
  0x18   :  { %s3432_s11 = smov 16   ;;  %s3433_s12 = smov 1  }
  0x19   :  { %64 = dma.hbm_to_vmem [thread:$0]  %s3676_s4, 32, %s59_s9, [#allocation8], %s3432_s11, %s3432_s11, %s3433_s12  }
  0x1a   :  { %s3434_s15 = smov [#allocation2]  }
  0x1b   :  { %s20_s16 = sshll.u32 %s3434_s15, 4  ;;  %s21_s16 = int_to_ptr.vmem [resolvable:$true] %s20_s16 }
  0x1c   :  { %s3370_s1 = scalar_lea.vmem %s21_s16, 256  ;;  %p3375_p11 = scmp.lt.s32.totalorder %s21_s16, %s21_s16 }
  0x1d   :  { %p3371_p10 = scmp.ne.s32.totalorder %s21_s16, %s3370_s1  ;;  %p3376_p12 = scmp.lt.s32.totalorder %s3370_s1, %s3370_s1 }
  0x1f   :  { %p3377_p13 = por %p3376_p12, %p3375_p11 }
  0x21   :  { %p3378_p0 = pnand %p3377_p13, %p3371_p10 }
  0x23   :  { %3381 = shalt.err (!%p3378_p0)
}
  0x24   :  { %s3435_s17 = smov 128   ;;  %s3436_s18 = smov 8  }
  0x25   :  { %26 = dma.hbm_to_vmem [thread:$0]  %s3672_s0, 256, %s21_s16, [#allocation3], %s3435_s17, %s3435_s17, %s3436_s18  }
  0x26   :  { %s3437_s21 = smov [#allocation6]   ;;  %s3438_s4 = smov [#allocation9]  }
  0x27   :  { %s46_s22 = sshll.u32 %s3437_s21, 4  ;;  %s70_s23 = sshll.u32 %s3438_s4, 4  ;;  %s47_s22 = int_to_ptr.vmem [resolvable:$true] %s46_s22  ;;  %s71_s23 = int_to_ptr.vmem [resolvable:$true] %s70_s23 }
  0x28   :  { %s3390_s24 = scalar_lea.vmem %s47_s22, 6144  ;;  %p3395_p2 = scmp.lt.s32.totalorder %s47_s22, %s47_s22 }
  0x29   :  { %p3391_p1 = scmp.ne.s32.totalorder %s47_s22, %s3390_s24  ;;  %p3396_p3 = scmp.lt.s32.totalorder %s3390_s24, %s3390_s24 }
  0x2b   :  { %p3397_p4 = por %p3396_p3, %p3395_p2 }
  0x2d   :  { %p3398_p5 = pnand %p3397_p4, %p3391_p1 }
  0x2f   :  { %3401 = shalt.err (!%p3398_p5)
}
  0x30   :  { %52 = dma.hbm_to_vmem [thread:$0]  %s3675_s3, 6144, %s47_s22, [#allocation5], %s3429_s27, %s3429_s27, %s3430_s28  }
  0x31   :  { %s3410_s0 = scalar_lea.vmem %s71_s23, 24576  ;;  %p3415_p7 = scmp.lt.s32.totalorder %s71_s23, %s71_s23 }
  0x32   :  { %p3411_p6 = scmp.ne.s32.totalorder %s71_s23, %s3410_s0  ;;  %p3416_p8 = scmp.lt.s32.totalorder %s3410_s0, %s3410_s0 }
  0x34   :  { %p3417_p9 = por %p3416_p8, %p3415_p7 }
  0x36   :  { %p3418_p10 = pnand %p3417_p9, %p3411_p6 }
  0x38   :  { %3421 = shalt.err (!%p3418_p10)
}
  0x39   :  { %s3439_s29 = smov 192   ;;  %s3440_s30 = smov 12  }
  0x3a   :  { %76 = dma.hbm_to_vmem [thread:$0]  %s3677_s5, 24576, %s71_s23, [#allocation8], %s3439_s29, %s3439_s29, %s3440_s30  }
  0x3b   :  { %3422 = dma.done.wait [#allocation3], 256  }
  0x3c   :  { %3423 = vsyncadd [#allocation3], 4294967040 }
  0x3d   :  { %3424 = dma.done.wait [#allocation5], 6656  }
  0x3e   :  { %3425 = vsyncadd [#allocation5], 4294960640 }
  0x3f   :  { %3426 = dma.done.wait [#allocation8], 24608  }
  0x40   :  { %3427 = vsyncadd [#allocation8], 4294942688  ;;  %v3441_v0 = vmov 0.0   ;;  %vm3442_vm0 = vmmov 0   ;;  %v3014_v1 = vld [vmem:[#allocation4 + $0x18] sm:$0xff]   ;;  %v3015_v2 = vld [vmem:[#allocation4 + $0x10] sm:$0xff]   ;;  %v182_v33 = vlaneseq }
  0x41   :  { %2946 = vmatprep.subr.bf16.mxu0 %v3441_v0  ;;  %2954 = vmatprep.mubr.msk.bf16.mxu0 %vm3442_vm0, %v3441_v0  ;;  %v3016_v3 = vld [vmem:[#allocation4 + $0x8] sm:$0xff]   ;;  %v3018_v4 = vld [vmem:[#allocation6 + $0x78] sm:$0xff]   ;;  %v3017_v6 = vld [vmem:[#allocation4] sm:$0xff]   ;;  %vm137_vm1 = vcmask 523264   ;;  %vm217_vm4 = vcmask 1040384   ;;  %vm225_vm7 = vcmask 1046528  }
  0x42   :  { %2947 = vmatpush3.bf16.msra.mxu0 %v3014_v1  ;;  %v3019_v5 = vld [vmem:[#allocation6 + $0x38] sm:$0xff]   ;;  %2796 = vmatprep.subr.bf16.mxu1 %v3018_v4  ;;  %v95_v7 = vld [vmem:[#allocation2] sm:$0xff]  ;;  %v3024_v11 = vld [vmem:[#allocation6 + $0x68] sm:$0xff]   ;;  %v3522_v34 = vshrl.u32 %v182_v33, 7  ;;  %vm844_vm14 = vcmask 1041409  }
  0x43   :  { %2948 = vmatprep.subr.bf16.mxu0 %v3441_v0  ;;  %2797 = vmatpush3.bf16.msra.mxu1 %v3019_v5  ;;  %v3021_v8 = vld [vmem:[#allocation6 + $0x70] sm:$0xff]   ;;  %v96_v10 = vld [vmem:[#allocation2 + $0x8] sm:$0xff]  ;;  %v3025_v12 = vld [vmem:[#allocation6 + $0x28] sm:$0xff]  }
  0x44   :  { %v3022_v9 = vld [vmem:[#allocation6 + $0x30] sm:$0xff]   ;;  %2798 = vmatprep.subr.bf16.mxu1 %v3021_v8  ;;  %v97_v13 = vpack.c.bf16 %v96_v10, %v95_v7  ;;  %v3020_v14 = vld [vmem:[#allocation6 + $0xb8] sm:$0xff]   ;;  %v3027_v15 = vld [vmem:[#allocation6 + $0x60] sm:$0xff]   ;;  %v184_v35 = vadd.s32 8, %v3522_v34  ;;  %v189_v38 = vand.u32 7, %v3522_v34 }
  0x45   :  { %v3028_v16 = vld [vmem:[#allocation6 + $0x20] sm:$0xff]   ;;  %v3030_v17 = vld [vmem:[#allocation6 + $0x58] sm:$0xff]   ;;  %v3023_v18 = vld [vmem:[#allocation6 + $0xb0] sm:$0xff]  }
  0x46   :  { %2949 = vmatpush3.bf16.msra.mxu0 %v3015_v2  ;;  %v3031_v19 = vld [vmem:[#allocation6 + $0x18] sm:$0xff]   ;;  %v3026_v20 = vld [vmem:[#allocation6 + $0xa8] sm:$0xff]   ;;  %v3029_v21 = vld [vmem:[#allocation6 + $0xa0] sm:$0xff]   ;;  %v196_v39 = vand.u32 7, %v184_v35  ;;  %vm3533_vm2 = vcmp.ne.s32.totalorder %v189_v38, 0  ;;  %vm3542_vm5 = vcmp.ne.s32.totalorder %v189_v38, 7 }
  0x47   :  { %2950 = vmatprep.subr.bf16.mxu0 %v3441_v0  ;;  %2799 = vmatpush3.bf16.msra.mxu1 %v3022_v9  ;;  %v3032_v22 = vld [vmem:[#allocation6 + $0x98] sm:$0xff]   ;;  %v3033_v23 = vld [vmem:[#allocation6 + $0x50] sm:$0xff]   ;;  %v3036_v26 = vld [vmem:[#allocation6 + $0x48] sm:$0xff]  }
  0x48   :  { %2800 = vmatprep.subr.bf16.mxu1 %v3024_v11  ;;  %v3034_v24 = vld [vmem:[#allocation6 + $0x10] sm:$0xff]   ;;  %v3037_v27 = vld [vmem:[#allocation6 + $0x8] sm:$0xff]   ;;  %v3039_v29 = vld [vmem:[#allocation6 + $0x40] sm:$0xff]   ;;  %vm3537_vm3 = vcmp.ne.s32.totalorder %v196_v39, 0  ;;  %vm3546_vm6 = vcmp.ne.s32.totalorder %v196_v39, 7 }
  0x49   :  { %v3035_v25 = vld [vmem:[#allocation6 + $0x90] sm:$0xff]   ;;  %v3038_v28 = vld [vmem:[#allocation6 + $0x88] sm:$0xff]   ;;  %v3040_v30 = vld [vmem:[#allocation6] sm:$0xff]  }
  0x4a   :  { %2951 = vmatpush3.bf16.msra.mxu0 %v3016_v3  ;;  %v3041_v31 = vld [vmem:[#allocation6 + $0x80] sm:$0xff]   ;;  %v3042_v32 = vld [vmem:[#allocation6 + $0x138] sm:$0xff]   ;;  %v2531_v36 = vld [vmem:[%s3674_s2] ss:$0 sm:$0xff] }
  0x4b   :  { %2952 = vmatprep.subr.bf16.mxu0 %v3441_v0  ;;  %2801 = vmatpush3.bf16.msra.mxu1 %v3025_v12  ;;  %vm2562_vm8 = vmpackc.low %vm3537_vm3, %vm3533_vm2  ;;  %v3043_v58 = vld [vmem:[#allocation6 + $0xf8] sm:$0xff]   ;;  %v3045_v62 = vld [vmem:[#allocation6 + $0x130] sm:$0xff]  }
  0x4c   :  { %2802 = vmatprep.subr.bf16.mxu1 %v3027_v15  ;;  %vm2565_vm9 = vmpackc.low %vm3546_vm6, %vm3542_vm5  ;;  %v3044_v59 = vld [vmem:[#allocation6 + $0x178] sm:$0xff]   ;;  %v3046_v63 = vld [vmem:[#allocation6 + $0xf0] sm:$0xff]  }
  0x4d   :  { %v3047_v1 = vld [vmem:[#allocation6 + $0x170] sm:$0xff]   ;;  %v3048_v2 = vld [vmem:[#allocation6 + $0x128] sm:$0xff]   ;;  %v3051_v5 = vld [vmem:[#allocation6 + $0x120] sm:$0xff]  }
  0x4e   :  { %2953 = vmatpush3.bf16.msra.mxu0 %v3017_v6  ;;  %v3049_v3 = vld [vmem:[#allocation6 + $0xe8] sm:$0xff]   ;;  %v3052_v6 = vld [vmem:[#allocation6 + $0xe0] sm:$0xff]   ;;  %v3054_v8 = vld [vmem:[#allocation6 + $0x118] sm:$0xff]  }
  0x4f   :  { %2958 = vmatprep.subr.bf16.mxu0 %v3441_v0  ;;  %2803 = vmatpush3.bf16.msra.mxu1 %v3028_v16  ;;  %v3050_v4 = vld [vmem:[#allocation6 + $0x168] sm:$0xff]   ;;  %v3053_v7 = vld [vmem:[#allocation6 + $0x160] sm:$0xff]   ;;  %v3055_v9 = vld [vmem:[#allocation6 + $0xd8] sm:$0xff]  }
  0x50   :  { %2804 = vmatprep.subr.bf16.mxu1 %v3030_v17  ;;  %v3056_v10 = vld [vmem:[#allocation6 + $0x158] sm:$0xff]   ;;  %v3057_v11 = vld [vmem:[#allocation6 + $0x110] sm:$0xff]   ;;  %v3061_v15 = vld [vmem:[#allocation6 + $0xc8] sm:$0xff]  }
  0x51   :  { %2955 = vmatmul.mubr.msk.bf16.vlgmr.msra.gmra.mxu0 %vm137_vm1, %v97_v13  ;;  %v3058_v12 = vld [vmem:[#allocation6 + $0xd0] sm:$0xff]   ;;  %v3062_v16 = vld [vmem:[#allocation6 + $0x148] sm:$0xff]   ;;  %v3063_v17 = vld [vmem:[#allocation6 + $0x100] sm:$0xff]  }
  0x52   :  { %2959 = vmatpush3.bf16.msra.mxu0 %v3020_v14  ;;  %2974 = vmatprep.mubr.msk.bf16.mxu0 %vm3442_vm0, %v3441_v0  ;;  %v3059_v13 = vld [vmem:[#allocation6 + $0x150] sm:$0xff]   ;;  %v3060_v14 = vld [vmem:[#allocation6 + $0x108] sm:$0xff]  }
  0x53   :  { %2960 = vmatprep.subr.bf16.mxu0 %v3441_v0  ;;  %2805 = vmatpush3.bf16.msra.mxu1 %v3031_v19  ;;  %v3065_v19 = vld [vmem:[#allocation6 + $0x140] sm:$0xff]  }
  0x54   :  { %2806 = vmatprep.subr.bf16.mxu1 %v3033_v23  ;;  %v3078_v45 = vld [vmem:[#allocation9 + $0x78] ss:$12 sps:$4 sm:$0xff]   ;;  %v3084_v48 = vld [vmem:[#allocation9 + $0x60] ss:$12 sps:$4 sm:$0xff]  }
  0x55   :  { %v3081_v44 = vld [vmem:[#allocation9 + $0x1f8] ss:$12 sps:$4 sm:$0xff]  }
  0x56   :  { %2961 = vmatpush3.bf16.msra.mxu0 %v3023_v18  ;;  %v3064_v18 = vld [vmem:[#allocation6 + $0xc0] sm:$0xff]  }
  0x57   :  { %2962 = vmatprep.subr.bf16.mxu0 %v3441_v0  ;;  %2807 = vmatpush3.bf16.msra.mxu1 %v3034_v24  ;;  %v2537_v24 = vld [vmem:[#allocation7] ss:$0 sm:$0xff]  ;;  %v3089_v49 = vld [vmem:[#allocation9 + $0x1e4] ss:$12 sps:$4 sm:$0xff]  }
  0x58   :  { %2808 = vmatprep.subr.bf16.mxu1 %v3036_v26 }
  0x5a   :  { %2963 = vmatpush3.bf16.msra.mxu0 %v3026_v20  ;;  %v3068_v20 = vld [vmem:[#allocation9 + $0xac] ss:$12 sps:$4 sm:$0xff]  }
  0x5b   :  { %2964 = vmatprep.subr.bf16.mxu0 %v3441_v0  ;;  %2809 = vmatpush3.bf16.msra.mxu1 %v3037_v27 }
  0x5c   :  { %2810 = vmatprep.subr.bf16.mxu1 %v3039_v29 }
  0x5e   :  { %2965 = vmatpush3.bf16.msra.mxu0 %v3029_v21  ;;  %v3071_v21 = vld [vmem:[#allocation9 + $0x22c] ss:$12 sps:$4 sm:$0xff]  }
  0x5f   :  { %2966 = vmatprep.subr.bf16.mxu0 %v3441_v0  ;;  %2811 = vmatpush3.bf16.msra.mxu1 %v3040_v30 }
  0x60   :  { %2827 = vmatprep.subr.bf16.mxu1 %v3042_v32 }
  0x62   :  { %2967 = vmatpush3.bf16.msra.mxu0 %v3032_v22 }
  0x63   :  { %2968 = vmatprep.subr.bf16.mxu0 %v3441_v0 }
  0x66   :  { %2969 = vmatpush3.bf16.msra.mxu0 %v3035_v25 }
  0x67   :  { %2970 = vmatprep.subr.bf16.mxu0 %v3441_v0 }
  0x6a   :  { %2971 = vmatpush3.bf16.msra.mxu0 %v3038_v28 }
  0x6b   :  { %2972 = vmatprep.subr.bf16.mxu0 %v3441_v0 }
  0x6e   :  { %2973 = vmatpush3.bf16.msra.mxu0 %v3041_v31 }
  0x6f   :  { %2978 = vmatprep.subr.bf16.mxu0 %v3441_v0 }
 0x111   :  { %v175_v37 = vpop.f32.mrf.mxu0 }
 0x112   :  { %v3529_v40 = vadd.f32 %v2531_v36, %v175_v37 }
 0x113   :  { %v2956_v41 = vpop.f32.mrf.mxu0 }
 0x114   :  { %v218_v46 = vrot.slane %v3529_v40, 7  ;;  %v226_v50 = vrot.slane %v3529_v40, 1 }
 0x115   :  { %v178_v42 = vpop.f32.mrf.mxu0 }
 0x116   :  { %v3531_v43 = vadd.f32 %v2531_v36, %v178_v42 }
 0x117   :  { %v2957_v47 = vpop.f32.mrf.mxu0 }
 0x118   :  { %v214_v51 = vrot.slane %v3531_v43, 7  ;;  %v227_v52 = vrot.slane %v3531_v43, 1  ;;  %v236_v53 = vpack.c.bf16 %v3531_v43, %v3529_v40 }
 0x11a   :  { %469 = vmatprep.mubr.bf16.mxu1 %v236_v53  ;;  %v219_v54 = vsel %vm217_vm4, %v218_v46, %v214_v51  ;;  %v222_v55 = vsel %vm217_vm4, %v214_v51, %v218_v46  ;;  %v228_v56 = vsel %vm225_vm7, %v226_v50, %v227_v52  ;;  %v232_v57 = vsel %vm225_vm7, %v227_v52, %v226_v50 }
 0x11b   :  { %v2563_v60 = vpack.c.bf16 %v219_v54, %v222_v55  ;;  %v2566_v61 = vpack.c.bf16 %v232_v57, %v228_v56  ;;  %v3066_v56 = vld [vmem:[#allocation9 + $0xa8] ss:$12 sps:$4 sm:$0xff]  }
 0x11c   :  { %v3069_v57 = vld [vmem:[#allocation9 + $0x228] ss:$12 sps:$4 sm:$0xff]  }
 0x11d   :  { %2564 = vmatmul.mubr.msk.bf16.vlgmr.msra.gmra.mxu1 %vm2562_vm8, %v2563_v60  ;;  %2975 = vmatmul.mubr.msk.bf16.vlgmr.msra.gmra.mxu0 %vm2565_vm9, %v2566_v61  ;;  %v3074_v60 = vld [vmem:[#allocation9 + $0x94] ss:$12 sps:$4 sm:$0xff]  }
 0x11e   :  { %2828 = vmatpush3.bf16.msra.mxu1 %v3043_v58  ;;  %2979 = vmatpush3.bf16.msra.mxu0 %v3044_v59  ;;  %v3077_v61 = vld [vmem:[#allocation9 + $0x214] ss:$12 sps:$4 sm:$0xff]  }
 0x11f   :  { %2829 = vmatprep.subr.bf16.mxu1 %v3045_v62  ;;  %2980 = vmatprep.subr.bf16.mxu0 %v3441_v0  ;;  %v3072_v62 = vld [vmem:[#allocation9 + $0x90] ss:$12 sps:$4 sm:$0xff]  }
 0x120   :  { %2994 = vmatprep.mubr.msk.bf16.mxu0 %vm3442_vm0, %v3441_v0 }
 0x122   :  { %2830 = vmatpush3.bf16.msra.mxu1 %v3046_v63  ;;  %2981 = vmatpush3.bf16.msra.mxu0 %v3047_v1  ;;  %v3075_v63 = vld [vmem:[#allocation9 + $0x210] ss:$12 sps:$4 sm:$0xff]  }
 0x123   :  { %2831 = vmatprep.subr.bf16.mxu1 %v3048_v2  ;;  %2982 = vmatprep.subr.bf16.mxu0 %v3441_v0  ;;  %v3080_v1 = vld [vmem:[#allocation9 + $0x7c] ss:$12 sps:$4 sm:$0xff]  }
 0x124   :  { %v3083_v2 = vld [vmem:[#allocation9 + $0x1fc] ss:$12 sps:$4 sm:$0xff]  }
 0x126   :  { %2832 = vmatpush3.bf16.msra.mxu1 %v3049_v3  ;;  %2983 = vmatpush3.bf16.msra.mxu0 %v3050_v4  ;;  %v3086_v3 = vld [vmem:[#allocation9 + $0x64] ss:$12 sps:$4 sm:$0xff]   ;;  %v3087_v4 = vld [vmem:[#allocation9 + $0x1e0] ss:$12 sps:$4 sm:$0xff]  }
 0x127   :  { %2984 = vmatprep.subr.bf16.mxu0 %v3441_v0  ;;  %2833 = vmatprep.subr.bf16.mxu1 %v3051_v5  ;;  %v3092_v5 = vld [vmem:[#allocation9 + $0x4c] ss:$12 sps:$4 sm:$0xff]  }
 0x12a   :  { %2834 = vmatpush3.bf16.msra.mxu1 %v3052_v6  ;;  %2985 = vmatpush3.bf16.msra.mxu0 %v3053_v7  ;;  %v3095_v6 = vld [vmem:[#allocation9 + $0x1cc] ss:$12 sps:$4 sm:$0xff]   ;;  %v3090_v7 = vld [vmem:[#allocation9 + $0x48] ss:$12 sps:$4 sm:$0xff]  }
 0x12b   :  { %2986 = vmatprep.subr.bf16.mxu0 %v3441_v0  ;;  %2835 = vmatprep.subr.bf16.mxu1 %v3054_v8  ;;  %v3093_v8 = vld [vmem:[#allocation9 + $0x1c8] ss:$12 sps:$4 sm:$0xff]  }
 0x12e   :  { %2836 = vmatpush3.bf16.msra.mxu1 %v3055_v9  ;;  %2987 = vmatpush3.bf16.msra.mxu0 %v3056_v10  ;;  %v3098_v9 = vld [vmem:[#allocation9 + $0x34] ss:$12 sps:$4 sm:$0xff]  }
 0x12f   :  { %2988 = vmatprep.subr.bf16.mxu0 %v3441_v0  ;;  %2837 = vmatprep.subr.bf16.mxu1 %v3057_v11  ;;  %v3101_v10 = vld [vmem:[#allocation9 + $0x1b4] ss:$12 sps:$4 sm:$0xff]   ;;  %v3096_v11 = vld [vmem:[#allocation9 + $0x30] ss:$12 sps:$4 sm:$0xff]  }
 0x132   :  { %2838 = vmatpush3.bf16.msra.mxu1 %v3058_v12  ;;  %2989 = vmatpush3.bf16.msra.mxu0 %v3059_v13  ;;  %v3099_v12 = vld [vmem:[#allocation9 + $0x1b0] ss:$12 sps:$4 sm:$0xff]  }
 0x133   :  { %2990 = vmatprep.subr.bf16.mxu0 %v3441_v0  ;;  %2839 = vmatprep.subr.bf16.mxu1 %v3060_v14  ;;  %v3104_v13 = vld [vmem:[#allocation9 + $0x1c] ss:$12 sps:$4 sm:$0xff]  }
 0x134   :  { %v3107_v14 = vld [vmem:[#allocation9 + $0x19c] ss:$12 sps:$4 sm:$0xff]  }
 0x136   :  { %2840 = vmatpush3.bf16.msra.mxu1 %v3061_v15  ;;  %2991 = vmatpush3.bf16.msra.mxu0 %v3062_v16  ;;  %v3102_v15 = vld [vmem:[#allocation9 + $0x18] ss:$12 sps:$4 sm:$0xff]  }
 0x137   :  { %2841 = vmatprep.subr.bf16.mxu1 %v3063_v17  ;;  %2992 = vmatprep.subr.bf16.mxu0 %v3441_v0  ;;  %v3105_v16 = vld [vmem:[#allocation9 + $0x198] ss:$12 sps:$4 sm:$0xff]  }
 0x138   :  { %v3110_v17 = vld [vmem:[#allocation9 + $0x4] ss:$12 sps:$4 sm:$0xff]  }
 0x13a   :  { %2842 = vmatpush3.bf16.msra.mxu1 %v3064_v18  ;;  %2993 = vmatpush3.bf16.msra.mxu0 %v3065_v19  ;;  %v3113_v18 = vld [vmem:[#allocation9 + $0x184] ss:$12 sps:$4 sm:$0xff]   ;;  %v3108_v19 = vld [vmem:[#allocation9] ss:$12 sps:$4 sm:$0xff]  }
 0x13b   :  { %2179 = vmatprep.subr.bf16.mxu1 %v3068_v20  ;;  %2220 = vmatprep.subr.bf16.mxu0 %v3071_v21  ;;  %v3111_v20 = vld [vmem:[#allocation9 + $0x180] ss:$12 sps:$4 sm:$0xff]  }
 0x13c   :  { %v3116_v21 = vld [vmem:[#allocation9 + $0x16c] ss:$12 sps:$4 sm:$0xff]  }
 0x1dd   :  { %v2812_v22 = vpop.f32.mrf.mxu1  ;;  %v512_v23 = vpop.f32.mrf.mxu0 }
 0x1df   :  { %v2813_v25 = vpop.f32.mrf.mxu1  ;;  %v2976_v26 = vpop.f32.mrf.mxu0 }
 0x1e0   :  { %v2814_v27 = vadd.f32 %v2813_v25, %v2812_v22  ;;  %v3119_v22 = vld [vmem:[#allocation9 + $0x2ec] ss:$12 sps:$4 sm:$0xff]   ;;  %v3122_v25 = vld [vmem:[#allocation9 + $0x154] ss:$12 sps:$4 sm:$0xff]  }
 0x1e1   :  { %v2815_v28 = vpop.f32.mrf.mxu1  ;;  %v515_v29 = vpop.f32.mrf.mxu0  ;;  %v3125_v26 = vld [vmem:[#allocation9 + $0x2d4] ss:$12 sps:$4 sm:$0xff]  }
 0x1e2   :  { %v472_v30 = vadd.f32 %v2814_v27, %v2537_v24  ;;  %v3120_v27 = vld [vmem:[#allocation9 + $0x150] ss:$12 sps:$4 sm:$0xff]  }
 0x1e3   :  { %v2816_v31 = vpop.f32.mrf.mxu1  ;;  %v2977_v32 = vpop.f32.mrf.mxu0 }
 0x1e4   :  { %v513_v33 = vadd.f32 %v512_v23, %v472_v30  ;;  %v2817_v0 = vadd.f32 %v2816_v31, %v2815_v28  ;;  %v3114_v23 = vld [vmem:[#allocation9 + $0x168] ss:$12 sps:$4 sm:$0xff]   ;;  %v3123_v28 = vld [vmem:[#allocation9 + $0x2d0] ss:$12 sps:$4 sm:$0xff]   ;;  %v3126_v31 = vld [vmem:[#allocation9 + $0x138] ss:$12 sps:$4 sm:$0xff]  }
 0x1e5   :  { %v3131_v30 = vld [vmem:[#allocation9 + $0x2bc] ss:$12 sps:$4 sm:$0xff]   ;;  %v3129_v32 = vld [vmem:[#allocation9 + $0x2b8] ss:$12 sps:$4 sm:$0xff]  }
 0x1e6   :  { %v519_v35 = vadd.f32 %v513_v33, %v3529_v40  ;;  %v475_v36 = vadd.f32 %v2817_v0, %v2537_v24  ;;  %v3117_v24 = vld [vmem:[#allocation9 + $0x2e8] ss:$12 sps:$4 sm:$0xff]   ;;  %v3134_v33 = vld [vmem:[#allocation9 + $0x124] ss:$12 sps:$4 sm:$0xff]   ;;  %v3132_v0 = vld [vmem:[#allocation9 + $0x120] ss:$12 sps:$4 sm:$0xff]  }
 0x1e8   :  { %v523_v37 = vmul.f32 0.2, %v519_v35  ;;  %v516_v38 = vadd.f32 %v515_v29, %v475_v36  ;;  %vm521_vm10 = vcmp.gt.f32.partialorder %v519_v35, 0.0  ;;  %v3128_v29 = vld [vmem:[#allocation9 + $0x13c] ss:$12 sps:$4 sm:$0xff]  }
 0x1e9   :  { %v3135_v36 = vld [vmem:[#allocation9 + $0x2a0] ss:$12 sps:$4 sm:$0xff]  }
 0x1ea   :  { %v520_v39 = vadd.f32 %v516_v38, %v3531_v43  ;;  %v3588_v41 = vsel %vm521_vm10, %v519_v35, %v523_v37  ;;  %v3137_v35 = vld [vmem:[#allocation9 + $0x2a4] ss:$12 sps:$4 sm:$0xff]   ;;  %v3140_v37 = vld [vmem:[#allocation9 + $0x10c] ss:$12 sps:$4 sm:$0xff]   ;;  %v3138_v38 = vld [vmem:[#allocation9 + $0x108] ss:$12 sps:$4 sm:$0xff]  }
 0x1eb   :  { %v531_v47 = vrot.slane %v3588_v41, 7  ;;  %v538_v51 = vrot.slane %v3588_v41, 1 }
 0x1ec   :  { %v524_v42 = vmul.f32 0.2, %v520_v39  ;;  %vm522_vm11 = vcmp.gt.f32.partialorder %v520_v39, 0.0 }
 0x1ee   :  { %v3590_v46 = vsel %vm522_vm11, %v520_v39, %v524_v42  ;;  %v3143_v39 = vld [vmem:[#allocation9 + $0x28c] ss:$12 sps:$4 sm:$0xff]   ;;  %v3141_v42 = vld [vmem:[#allocation9 + $0x288] ss:$12 sps:$4 sm:$0xff]  }
 0x1ef   :  { %v528_v50 = vrot.slane %v3590_v46, 7  ;;  %v539_v40 = vrot.slane %v3590_v46, 1  ;;  %v548_v52 = vpack.c.bf16 %v3590_v46, %v3588_v41 }
 0x1f1   :  { %783 = vmatprep.mubr.bf16.mxu1 %v548_v52  ;;  %v532_v43 = vsel %vm217_vm4, %v531_v47, %v528_v50  ;;  %v535_v53 = vsel %vm217_vm4, %v528_v50, %v531_v47  ;;  %v540_v54 = vsel %vm225_vm7, %v538_v51, %v539_v40  ;;  %v544_v55 = vsel %vm225_vm7, %v539_v40, %v538_v51  ;;  %v3146_v47 = vld [vmem:[#allocation9 + $0xf4] ss:$12 sps:$4 sm:$0xff]   ;;  %v3144_v50 = vld [vmem:[#allocation9 + $0xf0] ss:$12 sps:$4 sm:$0xff]  }
 0x1f2   :  { %v2594_v58 = vpack.c.bf16 %v532_v43, %v535_v53  ;;  %v2597_v59 = vpack.c.bf16 %v544_v55, %v540_v54  ;;  %v3149_v51 = vld [vmem:[#allocation9 + $0x274] ss:$12 sps:$4 sm:$0xff]   ;;  %v3147_v40 = vld [vmem:[#allocation9 + $0x270] ss:$12 sps:$4 sm:$0xff]   ;;  %v3150_v43 = vld [vmem:[#allocation9 + $0xd8] ss:$12 sps:$4 sm:$0xff]  }
 0x1f3   :  { %v3152_v52 = vld [vmem:[#allocation9 + $0xdc] ss:$12 sps:$4 sm:$0xff]   ;;  %v3153_v54 = vld [vmem:[#allocation9 + $0x258] ss:$12 sps:$4 sm:$0xff]  }
 0x1f4   :  { %2595 = vmatmul.mubr.msk.bf16.vlgmr.msra.gmra.mxu1 %vm2562_vm8, %v2594_v58  ;;  %2995 = vmatmul.mubr.msk.bf16.vlgmr.msra.gmra.mxu0 %vm2565_vm9, %v2597_v59  ;;  %v3155_v53 = vld [vmem:[#allocation9 + $0x25c] ss:$12 sps:$4 sm:$0xff]   ;;  %v3158_v55 = vld [vmem:[#allocation9 + $0xc4] ss:$12 sps:$4 sm:$0xff]   ;;  %v3164_v59 = vld [vmem:[#allocation9 + $0x3ac] ss:$12 sps:$4 sm:$0xff]  }
 0x1f5   :  { %2180 = vmatpush1.bf16.msra.mxu1 %v3066_v56  ;;  %2221 = vmatpush1.bf16.msra.mxu0 %v3069_v57  ;;  %v3156_v56 = vld [vmem:[#allocation9 + $0xc0] ss:$12 sps:$4 sm:$0xff]   ;;  %v3161_v58 = vld [vmem:[#allocation9 + $0x244] ss:$12 sps:$4 sm:$0xff]  }
 0x1f6   :  { %2181 = vmatprep.subr.bf16.mxu1 %v3074_v60  ;;  %2222 = vmatprep.subr.bf16.mxu0 %v3077_v61  ;;  %v3159_v57 = vld [vmem:[#allocation9 + $0x240] ss:$12 sps:$4 sm:$0xff]  }
 0x1f7   :  { %v3167_v60 = vld [vmem:[#allocation9 + $0x52c] ss:$12 sps:$4 sm:$0xff]  }
 0x1f9   :  { %2182 = vmatpush1.bf16.msra.mxu1 %v3072_v62  ;;  %2223 = vmatpush1.bf16.msra.mxu0 %v3075_v63  ;;  %v2568_v63 = vld [vmem:[#allocation7 + $0x1] ss:$0 sm:$0xff] }
 0x1fa   :  { %2183 = vmatprep.subr.bf16.mxu1 %v3080_v1  ;;  %2224 = vmatprep.subr.bf16.mxu0 %v3083_v2 }
 0x1fd   :  { %2184 = vmatpush1.bf16.msra.mxu1 %v3078_v45  ;;  %2225 = vmatpush1.bf16.msra.mxu0 %v3081_v44 }
 0x1fe   :  { %2185 = vmatprep.subr.bf16.mxu1 %v3086_v3  ;;  %2226 = vmatprep.subr.bf16.mxu0 %v3089_v49 }
 0x201   :  { %2186 = vmatpush1.bf16.msra.mxu1 %v3084_v48  ;;  %2227 = vmatpush1.bf16.msra.mxu0 %v3087_v4 }
 0x202   :  { %2187 = vmatprep.subr.bf16.mxu1 %v3092_v5  ;;  %2228 = vmatprep.subr.bf16.mxu0 %v3095_v6 }
 0x205   :  { %2188 = vmatpush1.bf16.msra.mxu1 %v3090_v7  ;;  %2229 = vmatpush1.bf16.msra.mxu0 %v3093_v8 }
 0x206   :  { %2189 = vmatprep.subr.bf16.mxu1 %v3098_v9  ;;  %2230 = vmatprep.subr.bf16.mxu0 %v3101_v10 }
 0x209   :  { %2190 = vmatpush1.bf16.msra.mxu1 %v3096_v11  ;;  %2231 = vmatpush1.bf16.msra.mxu0 %v3099_v12 }
 0x20a   :  { %2191 = vmatprep.subr.bf16.mxu1 %v3104_v13  ;;  %2232 = vmatprep.subr.bf16.mxu0 %v3107_v14 }
 0x20d   :  { %2192 = vmatpush1.bf16.msra.mxu1 %v3102_v15  ;;  %2233 = vmatpush1.bf16.msra.mxu0 %v3105_v16 }
 0x20e   :  { %2193 = vmatprep.subr.bf16.mxu1 %v3110_v17  ;;  %2234 = vmatprep.subr.bf16.mxu0 %v3113_v18 }
 0x211   :  { %2194 = vmatpush1.bf16.msra.mxu1 %v3108_v19  ;;  %2235 = vmatpush1.bf16.msra.mxu0 %v3111_v20 }
 0x212   :  { %2195 = vmatprep.subr.bf16.mxu1 %v3116_v21  ;;  %2236 = vmatprep.subr.bf16.mxu0 %v3119_v22 }
 0x215   :  { %2196 = vmatpush2.bf16.msra.mxu1 %v3114_v23  ;;  %2237 = vmatpush2.bf16.msra.mxu0 %v3117_v24 }
 0x216   :  { %2197 = vmatprep.subr.bf16.mxu1 %v3122_v25  ;;  %2238 = vmatprep.subr.bf16.mxu0 %v3125_v26 }
 0x219   :  { %2198 = vmatpush2.bf16.msra.mxu1 %v3120_v27  ;;  %2239 = vmatpush2.bf16.msra.mxu0 %v3123_v28  ;;  %v3162_v28 = vld [vmem:[#allocation9 + $0x3a8] ss:$12 sps:$4 sm:$0xff]  }
 0x21a   :  { %2199 = vmatprep.subr.bf16.mxu1 %v3128_v29  ;;  %2240 = vmatprep.subr.bf16.mxu0 %v3131_v30 }
 0x21d   :  { %2200 = vmatpush2.bf16.msra.mxu1 %v3126_v31  ;;  %2241 = vmatpush2.bf16.msra.mxu0 %v3129_v32 }
 0x21e   :  { %2201 = vmatprep.subr.bf16.mxu1 %v3134_v33  ;;  %2242 = vmatprep.subr.bf16.mxu0 %v3137_v35  ;;  %v3165_v35 = vld [vmem:[#allocation9 + $0x528] ss:$12 sps:$4 sm:$0xff]  }
 0x221   :  { %2202 = vmatpush2.bf16.msra.mxu1 %v3132_v0  ;;  %2243 = vmatpush2.bf16.msra.mxu0 %v3135_v36 }
 0x222   :  { %2203 = vmatprep.subr.bf16.mxu1 %v3140_v37  ;;  %2244 = vmatprep.subr.bf16.mxu0 %v3143_v39 }
 0x225   :  { %2204 = vmatpush2.bf16.msra.mxu1 %v3138_v38  ;;  %2245 = vmatpush2.bf16.msra.mxu0 %v3141_v42  ;;  %v3170_v42 = vld [vmem:[#allocation9 + $0x394] ss:$12 sps:$4 sm:$0xff]  }
 0x226   :  { %2205 = vmatprep.subr.bf16.mxu1 %v3146_v47  ;;  %2246 = vmatprep.subr.bf16.mxu0 %v3149_v51  ;;  %v3173_v51 = vld [vmem:[#allocation9 + $0x514] ss:$12 sps:$4 sm:$0xff]  }
 0x229   :  { %2206 = vmatpush2.bf16.msra.mxu1 %v3144_v50  ;;  %2247 = vmatpush2.bf16.msra.mxu0 %v3147_v40 }
 0x22a   :  { %2207 = vmatprep.subr.bf16.mxu1 %v3152_v52  ;;  %2248 = vmatprep.subr.bf16.mxu0 %v3155_v53  ;;  %v3168_v52 = vld [vmem:[#allocation9 + $0x390] ss:$12 sps:$4 sm:$0xff]  }
 0x22b   :  { %v3176_v53 = vld [vmem:[#allocation9 + $0x37c] ss:$12 sps:$4 sm:$0xff]  }
 0x22d   :  { %2208 = vmatpush2.bf16.msra.mxu1 %v3150_v43  ;;  %2249 = vmatpush2.bf16.msra.mxu0 %v3153_v54  ;;  %v3171_v43 = vld [vmem:[#allocation9 + $0x510] ss:$12 sps:$4 sm:$0xff]  }
 0x22e   :  { %2209 = vmatprep.subr.bf16.mxu1 %v3158_v55  ;;  %2250 = vmatprep.subr.bf16.mxu0 %v3161_v58  ;;  %v3179_v54 = vld [vmem:[#allocation9 + $0x4fc] ss:$12 sps:$4 sm:$0xff]   ;;  %v3174_v55 = vld [vmem:[#allocation9 + $0x378] ss:$12 sps:$4 sm:$0xff]  }
 0x22f   :  { %v3185_v58 = vld [vmem:[#allocation9 + $0x4e4] ss:$12 sps:$4 sm:$0xff]  }
 0x231   :  { %2210 = vmatpush2.bf16.msra.mxu1 %v3156_v56  ;;  %2251 = vmatpush2.bf16.msra.mxu0 %v3159_v57  ;;  %v3177_v56 = vld [vmem:[#allocation9 + $0x4f8] ss:$12 sps:$4 sm:$0xff]  }
 0x232   :  { %2261 = vmatprep.subr.bf16.mxu1 %v3164_v59  ;;  %2302 = vmatprep.subr.bf16.mxu0 %v3167_v60  ;;  %v3182_v57 = vld [vmem:[#allocation9 + $0x364] ss:$12 sps:$4 sm:$0xff]   ;;  %v3180_v59 = vld [vmem:[#allocation9 + $0x360] ss:$12 sps:$4 sm:$0xff]  }
 0x233   :  { %v3183_v60 = vld [vmem:[#allocation9 + $0x4e0] ss:$12 sps:$4 sm:$0xff]  }
 0x2b4   :  { %v2843_v61 = vpop.f32.mrf.mxu1  ;;  %v826_v62 = vpop.f32.mrf.mxu0 }
 0x2b6   :  { %v2844_v1 = vpop.f32.mrf.mxu1  ;;  %v2996_v2 = vpop.f32.mrf.mxu0 }
 0x2b7   :  { %v2845_v45 = vadd.f32 %v2844_v1, %v2843_v61  ;;  %v3188_v61 = vld [vmem:[#allocation9 + $0x34c] ss:$12 sps:$4 sm:$0xff]   ;;  %v3189_v1 = vld [vmem:[#allocation9 + $0x4c8] ss:$12 sps:$4 sm:$0xff]  }
 0x2b8   :  { %v2846_v44 = vpop.f32.mrf.mxu1  ;;  %v829_v3 = vpop.f32.mrf.mxu0  ;;  %v3194_v2 = vld [vmem:[#allocation9 + $0x334] ss:$12 sps:$4 sm:$0xff]  }
 0x2b9   :  { %v786_v49 = vadd.f32 %v2845_v45, %v2568_v63  ;;  %v3197_v45 = vld [vmem:[#allocation9 + $0x4b4] ss:$12 sps:$4 sm:$0xff]  }
 0x2ba   :  { %v2847_v48 = vpop.f32.mrf.mxu1  ;;  %v2997_v4 = vpop.f32.mrf.mxu0 }
 0x2bb   :  { %v827_v5 = vadd.f32 %v826_v62, %v786_v49  ;;  %v2848_v6 = vadd.f32 %v2847_v48, %v2846_v44  ;;  %v3191_v62 = vld [vmem:[#allocation9 + $0x4cc] ss:$12 sps:$4 sm:$0xff]   ;;  %v3192_v44 = vld [vmem:[#allocation9 + $0x330] ss:$12 sps:$4 sm:$0xff]  }
 0x2bc   :  { %v3200_v49 = vld [vmem:[#allocation9 + $0x31c] ss:$12 sps:$4 sm:$0xff]   ;;  %v3198_v4 = vld [vmem:[#allocation9 + $0x318] ss:$12 sps:$4 sm:$0xff]  }
 0x2bd   :  { %v833_v7 = vadd.f32 %v827_v5, %v3588_v41  ;;  %v789_v8 = vadd.f32 %v2848_v6, %v2568_v63  ;;  %v3186_v63 = vld [vmem:[#allocation9 + $0x348] ss:$12 sps:$4 sm:$0xff]   ;;  %v3201_v5 = vld [vmem:[#allocation9 + $0x498] ss:$12 sps:$4 sm:$0xff]  }
 0x2be   :  { %v3203_v48 = vld [vmem:[#allocation9 + $0x49c] ss:$12 sps:$4 sm:$0xff]   ;;  %v3206_v6 = vld [vmem:[#allocation9 + $0x304] ss:$12 sps:$4 sm:$0xff]  }
 0x2bf   :  { %vm835_vm12 = vcmp.gt.f32.partialorder %v833_v7, 0.0  ;;  %v837_v9 = vmul.f32 0.2, %v833_v7  ;;  %v830_v10 = vadd.f32 %v829_v3, %v789_v8  ;;  %v3195_v3 = vld [vmem:[#allocation9 + $0x4b0] ss:$12 sps:$4 sm:$0xff]  }
 0x2c0   :  { %v3204_v8 = vld [vmem:[#allocation9 + $0x300] ss:$12 sps:$4 sm:$0xff]  }
 0x2c1   :  { %v839_v11 = vsel %vm835_vm12, %v833_v7, %v837_v9  ;;  %v834_v12 = vadd.f32 %v830_v10, %v3590_v46  ;;  %v3209_v7 = vld [vmem:[#allocation9 + $0x484] ss:$12 sps:$4 sm:$0xff]   ;;  %v3207_v9 = vld [vmem:[#allocation9 + $0x480] ss:$12 sps:$4 sm:$0xff]  }
 0x2c2   :  { %v847_v14 = vrot.slane %v839_v11, 1  ;;  %v854_v15 = vrot.slane %v839_v11, 3  ;;  %v850_v16 = vrot.slane %v839_v11, 2  ;;  %v862_v17 = vrot.slane %v839_v11, 5  ;;  %v3212_v10 = vld [vmem:[#allocation9 + $0x46c] ss:$12 sps:$4 sm:$0xff]  }
 0x2c3   :  { %vm836_vm13 = vcmp.gt.f32.partialorder %v834_v12, 0.0  ;;  %v838_v13 = vmul.f32 0.2, %v834_v12  ;;  %v870_v19 = vrot.slane %v839_v11, 7  ;;  %v858_v20 = vrot.slane %v839_v11, 4 }
 0x2c4   :  { %v866_v21 = vrot.slane %v839_v11, 6 }
 0x2c5   :  { %v840_v18 = vsel %vm836_vm13, %v834_v12, %v838_v13  ;;  %v3210_v12 = vld [vmem:[#allocation9 + $0x468] ss:$12 sps:$4 sm:$0xff]  }
 0x2c6   :  { %v848_v41 = vsel %vm844_vm14, %v840_v18, %v847_v14  ;;  %v843_v22 = vrot.slane %v840_v18, 7  ;;  %v855_v23 = vrot.slane %v840_v18, 2  ;;  %v851_v24 = vrot.slane %v840_v18, 1  ;;  %v3213_v13 = vld [vmem:[#allocation9 + $0x5e8] ss:$12 sps:$4 sm:$0xff]  }
 0x2c7   :  { %v3615_v25 = vpack.c.bf16 %v848_v41, %v848_v41  ;;  %v863_v26 = vrot.slane %v840_v18, 4  ;;  %v871_v46 = vrot.slane %v840_v18, 6  ;;  %v859_v27 = vrot.slane %v840_v18, 3  ;;  %v3218_v14 = vld [vmem:[#allocation9 + $0x454] ss:$12 sps:$4 sm:$0xff]  }
 0x2c8   :  { %v845_v29 = vsel %vm844_vm14, %v843_v22, %v839_v11  ;;  %v856_v30 = vsel %vm844_vm14, %v855_v23, %v854_v15  ;;  %v852_v31 = vsel %vm844_vm14, %v851_v24, %v850_v16  ;;  %v867_v32 = vrot.slane %v840_v18, 5  ;;  %v3215_v11 = vld [vmem:[#allocation9 + $0x5ec] ss:$12 sps:$4 sm:$0xff]   ;;  %v3221_v15 = vld [vmem:[#allocation9 + $0x5d4] ss:$12 sps:$4 sm:$0xff]  }
 0x2c9   :  { %2211 = vmatprep.mubr.bf16.mxu1 %v3615_v25  ;;  %v3621_v33 = vpack.c.bf16 %v845_v29, %v845_v29  ;;  %v3623_v0 = vpack.c.bf16 %v856_v30, %v856_v30  ;;  %v3625_v36 = vpack.c.bf16 %v852_v31, %v852_v31  ;;  %v864_v37 = vsel %vm844_vm14, %v863_v26, %v862_v17  ;;  %v3216_v16 = vld [vmem:[#allocation9 + $0x450] ss:$12 sps:$4 sm:$0xff]   ;;  %v3228_v23 = vld [vmem:[#allocation9 + $0x420] ss:$12 sps:$4 sm:$0xff]  }
 0x2ca   :  { %v3628_v38 = vpack.c.bf16 %v864_v37, %v864_v37  ;;  %v872_v39 = vsel %vm844_vm14, %v871_v46, %v870_v19  ;;  %v3632_v47 = vsel %vm844_vm14, %v859_v27, %v858_v20  ;;  %v3635_v50 = vsel %vm844_vm14, %v867_v32, %v866_v21  ;;  %v3219_v17 = vld [vmem:[#allocation9 + $0x5d0] ss:$12 sps:$4 sm:$0xff]   ;;  %v3222_v20 = vld [vmem:[#allocation9 + $0x438] ss:$12 sps:$4 sm:$0xff]   ;;  %v3231_v24 = vld [vmem:[#allocation9 + $0x5a0] ss:$12 sps:$4 sm:$0xff]  }
 0x2cb   :  { %2212 = vmatmul.mubr.bf16.vlgmr.msra.gmra.mxu1 %v3621_v33  ;;  %2252 = vmatprep.mubr.bf16.mxu0 %v3623_v0  ;;  %v3640_v40 = vpack.c.bf16 %v872_v39, %v872_v39  ;;  %v3224_v18 = vld [vmem:[#allocation9 + $0x43c] ss:$12 sps:$4 sm:$0xff]   ;;  %v3225_v21 = vld [vmem:[#allocation9 + $0x5b8] ss:$12 sps:$4 sm:$0xff]   ;;  %v3242_v29 = vld [vmem:[#allocation9 + $0x3f4] ss:$12 sps:$4 sm:$0xff]  }
 0x2cc   :  { %2262 = vmatpush1.bf16.msra.mxu1 %v3162_v28  ;;  %2253 = vmatmul.mubr.bf16.vlgmr.msra.gmra.mxu0 %v3625_v36  ;;  %v3227_v19 = vld [vmem:[#allocation9 + $0x5bc] ss:$12 sps:$4 sm:$0xff]   ;;  %v3230_v41 = vld [vmem:[#allocation9 + $0x424] ss:$12 sps:$4 sm:$0xff]   ;;  %v3236_v26 = vld [vmem:[#allocation9 + $0x40c] ss:$12 sps:$4 sm:$0xff]  }
 0x2cd   :  { %2293 = vmatprep.mubr.bf16.mxu1 %v3628_v38  ;;  %2303 = vmatpush1.bf16.msra.mxu0 %v3165_v35  ;;  %v3233_v22 = vld [vmem:[#allocation9 + $0x5a4] ss:$12 sps:$4 sm:$0xff]   ;;  %v3239_v46 = vld [vmem:[#allocation9 + $0x58c] ss:$12 sps:$4 sm:$0xff]   ;;  %v3234_v27 = vld [vmem:[#allocation9 + $0x408] ss:$12 sps:$4 sm:$0xff]  }
 0x2ce   :  { %2334 = vmatprep.mubr.bf16.mxu0 %v3640_v40  ;;  %2263 = vmatprep.subr.bf16.mxu1 %v3170_v42  ;;  %v3237_v28 = vld [vmem:[#allocation9 + $0x588] ss:$12 sps:$4 sm:$0xff]   ;;  %v3240_v31 = vld [vmem:[#allocation9 + $0x3f0] ss:$12 sps:$4 sm:$0xff]   ;;  %v3246_v39 = vld [vmem:[#allocation9 + $0x3d8] ss:$12 sps:$4 sm:$0xff]  }
 0x2cf   :  { %2304 = vmatprep.subr.bf16.mxu0 %v3173_v51  ;;  %v3245_v30 = vld [vmem:[#allocation9 + $0x574] ss:$12 sps:$4 sm:$0xff]   ;;  %v3243_v32 = vld [vmem:[#allocation9 + $0x570] ss:$12 sps:$4 sm:$0xff]   ;;  %v3249_v42 = vld [vmem:[#allocation9 + $0x558] ss:$12 sps:$4 sm:$0xff]  }
 0x2d0   :  { %2264 = vmatpush1.bf16.msra.mxu1 %v3168_v52  ;;  %v3248_v35 = vld [vmem:[#allocation9 + $0x3dc] ss:$12 sps:$4 sm:$0xff]   ;;  %v3254_v51 = vld [vmem:[#allocation9 + $0x3c4] ss:$12 sps:$4 sm:$0xff]  }
 0x2d1   :  { %2305 = vmatpush1.bf16.msra.mxu0 %v3171_v43  ;;  %2265 = vmatprep.subr.bf16.mxu1 %v3176_v53  ;;  %v3251_v37 = vld [vmem:[#allocation9 + $0x55c] ss:$12 sps:$4 sm:$0xff]   ;;  %v3257_v52 = vld [vmem:[#allocation9 + $0x544] ss:$12 sps:$4 sm:$0xff]   ;;  %v3252_v43 = vld [vmem:[#allocation9 + $0x3c0] ss:$12 sps:$4 sm:$0xff]  }
 0x2d2   :  { %2306 = vmatprep.subr.bf16.mxu0 %v3179_v54  ;;  %v3255_v53 = vld [vmem:[#allocation9 + $0x540] ss:$12 sps:$4 sm:$0xff]   ;;  %v3258_v54 = vld [vmem:[#allocation9 + $0x170] ss:$12 sps:$4 sm:$0xff]  }
 0x2d4   :  { %2266 = vmatpush1.bf16.msra.mxu1 %v3174_v55  ;;  %v3260_v55 = vld [vmem:[#allocation9 + $0x2f0] ss:$12 sps:$4 sm:$0xff]  }
 0x2d5   :  { %2307 = vmatpush1.bf16.msra.mxu0 %v3177_v56  ;;  %2267 = vmatprep.subr.bf16.mxu1 %v3182_v57  ;;  %v3259_v56 = vld [vmem:[#allocation9 + $0xb0] ss:$12 sps:$4 sm:$0xff]   ;;  %v3646_v57 = vpack.c.bf16 %v3632_v47, %v3632_v47  ;;  %v3265_v47 = vld [vmem:[#allocation9 + $0x218] ss:$12 sps:$4 sm:$0xff]  }
 0x2d6   :  { %2308 = vmatprep.subr.bf16.mxu0 %v3185_v58  ;;  %v3261_v58 = vld [vmem:[#allocation9 + $0x230] ss:$12 sps:$4 sm:$0xff]  }
 0x2d8   :  { %2268 = vmatpush1.bf16.msra.mxu1 %v3180_v59  ;;  %v3650_v59 = vpack.c.bf16 %v3635_v50, %v3635_v50  ;;  %v3267_v50 = vld [vmem:[#allocation9 + $0x80] ss:$12 sps:$4 sm:$0xff]  }
 0x2d9   :  { %2309 = vmatpush1.bf16.msra.mxu0 %v3183_v60  ;;  %2269 = vmatprep.subr.bf16.mxu1 %v3188_v61  ;;  %v3262_v60 = vld [vmem:[#allocation9 + $0x158] ss:$12 sps:$4 sm:$0xff]  }
 0x2da   :  { %2310 = vmatprep.subr.bf16.mxu0 %v3191_v62  ;;  %v3264_v61 = vld [vmem:[#allocation9 + $0x2d8] ss:$12 sps:$4 sm:$0xff]  }
 0x2db   :  { %v3263_v62 = vld [vmem:[#allocation9 + $0x98] ss:$12 sps:$4 sm:$0xff]  }
 0x2dc   :  { %2270 = vmatpush1.bf16.msra.mxu1 %v3186_v63  ;;  %v3266_v63 = vld [vmem:[#allocation9 + $0x140] ss:$12 sps:$4 sm:$0xff]  }
 0x2dd   :  { %2311 = vmatpush1.bf16.msra.mxu0 %v3189_v1  ;;  %2271 = vmatprep.subr.bf16.mxu1 %v3194_v2  ;;  %v3268_v1 = vld [vmem:[#allocation9 + $0x2c0] ss:$12 sps:$4 sm:$0xff]  }
 0x2de   :  { %2312 = vmatprep.subr.bf16.mxu0 %v3197_v45  ;;  %v3269_v2 = vld [vmem:[#allocation9 + $0x200] ss:$12 sps:$4 sm:$0xff]   ;;  %v3270_v45 = vld [vmem:[#allocation9 + $0x128] ss:$12 sps:$4 sm:$0xff]  }
 0x2e0   :  { %2272 = vmatpush1.bf16.msra.mxu1 %v3192_v44  ;;  %v3272_v44 = vld [vmem:[#allocation9 + $0x2a8] ss:$12 sps:$4 sm:$0xff]  }
 0x2e1   :  { %2313 = vmatpush1.bf16.msra.mxu0 %v3195_v3  ;;  %2273 = vmatprep.subr.bf16.mxu1 %v3200_v49  ;;  %v3271_v3 = vld [vmem:[#allocation9 + $0x68] ss:$12 sps:$4 sm:$0xff]   ;;  %v3274_v49 = vld [vmem:[#allocation9 + $0x110] ss:$12 sps:$4 sm:$0xff]  }
 0x2e2   :  { %2314 = vmatprep.subr.bf16.mxu0 %v3203_v48  ;;  %v3276_v48 = vld [vmem:[#allocation9 + $0x290] ss:$12 sps:$4 sm:$0xff]  }
 0x2e4   :  { %2274 = vmatpush1.bf16.msra.mxu1 %v3198_v4  ;;  %v3277_v4 = vld [vmem:[#allocation9 + $0x1d0] ss:$12 sps:$4 sm:$0xff]  }
 0x2e5   :  { %2315 = vmatpush1.bf16.msra.mxu0 %v3201_v5  ;;  %2275 = vmatprep.subr.bf16.mxu1 %v3206_v6  ;;  %v3278_v5 = vld [vmem:[#allocation9 + $0xf8] ss:$12 sps:$4 sm:$0xff]  }
 0x2e6   :  { %2316 = vmatprep.subr.bf16.mxu0 %v3209_v7  ;;  %v3280_v6 = vld [vmem:[#allocation9 + $0x278] ss:$12 sps:$4 sm:$0xff]  }
 0x2e7   :  { %v3279_v7 = vld [vmem:[#allocation9 + $0x38] ss:$12 sps:$4 sm:$0xff]  }
 0x2e8   :  { %2276 = vmatpush1.bf16.msra.mxu1 %v3204_v8  ;;  %v3281_v8 = vld [vmem:[#allocation9 + $0x1b8] ss:$12 sps:$4 sm:$0xff]  }
 0x2e9   :  { %2317 = vmatpush1.bf16.msra.mxu0 %v3207_v9  ;;  %2277 = vmatprep.subr.bf16.mxu1 %v3212_v10  ;;  %v3282_v9 = vld [vmem:[#allocation9 + $0xe0] ss:$12 sps:$4 sm:$0xff]  }
 0x2ea   :  { %2318 = vmatprep.subr.bf16.mxu0 %v3215_v11  ;;  %v3284_v10 = vld [vmem:[#allocation9 + $0x260] ss:$12 sps:$4 sm:$0xff]  }
 0x2eb   :  { %v3283_v11 = vld [vmem:[#allocation9 + $0x20] ss:$12 sps:$4 sm:$0xff]  }
 0x2ec   :  { %2278 = vmatpush2.bf16.msra.mxu1 %v3210_v12  ;;  %v3285_v12 = vld [vmem:[#allocation9 + $0x1a0] ss:$12 sps:$4 sm:$0xff]  }
 0x2ed   :  { %2319 = vmatpush2.bf16.msra.mxu0 %v3213_v13  ;;  %2279 = vmatprep.subr.bf16.mxu1 %v3218_v14  ;;  %v3286_v13 = vld [vmem:[#allocation9 + $0xc8] ss:$12 sps:$4 sm:$0xff]  }
 0x2ee   :  { %2320 = vmatprep.subr.bf16.mxu0 %v3221_v15  ;;  %v3288_v14 = vld [vmem:[#allocation9 + $0x248] ss:$12 sps:$4 sm:$0xff]  }
 0x2ef   :  { %v3287_v15 = vld [vmem:[#allocation9 + $0x8] ss:$12 sps:$4 sm:$0xff]  }
 0x2f0   :  { %2280 = vmatpush2.bf16.msra.mxu1 %v3216_v16  ;;  %v3289_v16 = vld [vmem:[#allocation9 + $0x188] ss:$12 sps:$4 sm:$0xff]  }
 0x2f1   :  { %2321 = vmatpush2.bf16.msra.mxu0 %v3219_v17  ;;  %2281 = vmatprep.subr.bf16.mxu1 %v3224_v18  ;;  %v3290_v17 = vld [vmem:[#allocation9 + $0x470] ss:$12 sps:$4 sm:$0xff]  }
 0x2f2   :  { %2322 = vmatprep.subr.bf16.mxu0 %v3227_v19  ;;  %v3292_v18 = vld [vmem:[#allocation9 + $0x5f0] ss:$12 sps:$4 sm:$0xff]  }
 0x2f3   :  { %v3291_v19 = vld [vmem:[#allocation9 + $0x3b0] ss:$12 sps:$4 sm:$0xff]  }
 0x2f4   :  { %2282 = vmatpush2.bf16.msra.mxu1 %v3222_v20  ;;  %v3293_v20 = vld [vmem:[#allocation9 + $0x530] ss:$12 sps:$4 sm:$0xff]  }
 0x2f5   :  { %2323 = vmatpush2.bf16.msra.mxu0 %v3225_v21  ;;  %2283 = vmatprep.subr.bf16.mxu1 %v3230_v41  ;;  %v3294_v21 = vld [vmem:[#allocation9 + $0x458] ss:$12 sps:$4 sm:$0xff]  }
 0x2f6   :  { %2324 = vmatprep.subr.bf16.mxu0 %v3233_v22  ;;  %v3296_v41 = vld [vmem:[#allocation9 + $0x5d8] ss:$12 sps:$4 sm:$0xff]  }
 0x2f7   :  { %v3295_v22 = vld [vmem:[#allocation9 + $0x398] ss:$12 sps:$4 sm:$0xff]  }
 0x2f8   :  { %2284 = vmatpush2.bf16.msra.mxu1 %v3228_v23  ;;  %v3297_v23 = vld [vmem:[#allocation9 + $0x518] ss:$12 sps:$4 sm:$0xff]  }
 0x2f9   :  { %2325 = vmatpush2.bf16.msra.mxu0 %v3231_v24  ;;  %2285 = vmatprep.subr.bf16.mxu1 %v3236_v26  ;;  %v3298_v24 = vld [vmem:[#allocation9 + $0x440] ss:$12 sps:$4 sm:$0xff]  }
 0x2fa   :  { %2326 = vmatprep.subr.bf16.mxu0 %v3239_v46  ;;  %v3300_v26 = vld [vmem:[#allocation9 + $0x5c0] ss:$12 sps:$4 sm:$0xff]  }
 0x2fb   :  { %v3299_v46 = vld [vmem:[#allocation9 + $0x380] ss:$12 sps:$4 sm:$0xff]  }
 0x2fc   :  { %2286 = vmatpush2.bf16.msra.mxu1 %v3234_v27  ;;  %v3302_v27 = vld [vmem:[#allocation9 + $0x428] ss:$12 sps:$4 sm:$0xff]  }
 0x2fd   :  { %2327 = vmatpush2.bf16.msra.mxu0 %v3237_v28  ;;  %2287 = vmatprep.subr.bf16.mxu1 %v3242_v29  ;;  %v3303_v28 = vld [vmem:[#allocation9 + $0x368] ss:$12 sps:$4 sm:$0xff]   ;;  %v3306_v29 = vld [vmem:[#allocation9 + $0x410] ss:$12 sps:$4 sm:$0xff]  }
 0x2fe   :  { %2328 = vmatprep.subr.bf16.mxu0 %v3245_v30  ;;  %v3308_v30 = vld [vmem:[#allocation9 + $0x590] ss:$12 sps:$4 sm:$0xff]  }
 0x300   :  { %2288 = vmatpush2.bf16.msra.mxu1 %v3240_v31  ;;  %v3309_v31 = vld [vmem:[#allocation9 + $0x4d0] ss:$12 sps:$4 sm:$0xff]  }
 0x301   :  { %2329 = vmatpush2.bf16.msra.mxu0 %v3243_v32  ;;  %2289 = vmatprep.subr.bf16.mxu1 %v3248_v35  ;;  %v3310_v32 = vld [vmem:[#allocation9 + $0x3f8] ss:$12 sps:$4 sm:$0xff]  }
 0x302   :  { %2330 = vmatprep.subr.bf16.mxu0 %v3251_v37  ;;  %v3312_v35 = vld [vmem:[#allocation9 + $0x578] ss:$12 sps:$4 sm:$0xff]  }
 0x303   :  { %v3311_v37 = vld [vmem:[#allocation9 + $0x338] ss:$12 sps:$4 sm:$0xff]  }
 0x304   :  { %2290 = vmatpush2.bf16.msra.mxu1 %v3246_v39  ;;  %v3313_v39 = vld [vmem:[#allocation9 + $0x4b8] ss:$12 sps:$4 sm:$0xff]  }
 0x305   :  { %2331 = vmatpush2.bf16.msra.mxu0 %v3249_v42  ;;  %2291 = vmatprep.subr.bf16.mxu1 %v3254_v51  ;;  %v3314_v42 = vld [vmem:[#allocation9 + $0x3e0] ss:$12 sps:$4 sm:$0xff]  }
 0x306   :  { %2332 = vmatprep.subr.bf16.mxu0 %v3257_v52  ;;  %v3316_v51 = vld [vmem:[#allocation9 + $0x560] ss:$12 sps:$4 sm:$0xff]  }
 0x307   :  { %v3315_v52 = vld [vmem:[#allocation9 + $0x320] ss:$12 sps:$4 sm:$0xff]  }
 0x308   :  { %2292 = vmatpush2.bf16.msra.mxu1 %v3252_v43  ;;  %v3317_v43 = vld [vmem:[#allocation9 + $0x4a0] ss:$12 sps:$4 sm:$0xff]  }
 0x309   :  { %2333 = vmatpush2.bf16.msra.mxu0 %v3255_v53  ;;  %2858 = vmatprep.subr.bf16.mxu1 %v3258_v54  ;;  %v3318_v53 = vld [vmem:[#allocation9 + $0x3c8] ss:$12 sps:$4 sm:$0xff]  }
 0x30a   :  { %2880 = vmatprep.subr.bf16.mxu0 %v3260_v55  ;;  %v3320_v54 = vld [vmem:[#allocation9 + $0x548] ss:$12 sps:$4 sm:$0xff]  }
 0x30b   :  { %2294 = vmatmul.mubr.bf16.vlgmr.msra.gmra.mxu1 %v3646_v57  ;;  %v3319_v55 = vld [vmem:[#allocation9 + $0x308] ss:$12 sps:$4 sm:$0xff]  }
 0x30c   :  { %2335 = vmatmul.mubr.bf16.vlgmr.msra.gmra.mxu0 %v3650_v59  ;;  %2859 = vmatpush3.bf16.msra.mxu1 %v3259_v56  ;;  %v3321_v56 = vld [vmem:[#allocation9 + $0x488] ss:$12 sps:$4 sm:$0xff]  }
 0x30d   :  { %2375 = vmatprep.mubr.bf16.mxu1 %v3615_v25  ;;  %2881 = vmatpush3.bf16.msra.mxu0 %v3261_v58  ;;  %v3273_v25 = vld [vmem:[#allocation9 + $0x1e8] ss:$12 sps:$4 sm:$0xff]   ;;  %v1142_v58 = vsub.s32 0, %v3522_v34 }
 0x30e   :  { %2415 = vmatprep.mubr.bf16.mxu0 %v3623_v0  ;;  %2860 = vmatprep.subr.bf16.mxu1 %v3262_v60  ;;  %v3275_v0 = vld [vmem:[#allocation9 + $0x50] ss:$12 sps:$4 sm:$0xff]  }
 0x30f   :  { %2882 = vmatprep.subr.bf16.mxu0 %v3264_v61  ;;  %v1138_v60 = vld [vmem:[%s3678_s6] sm:$0x7]  ;;  %v1146_v61 = vsub.s32 1, %v3522_v34 }
 0x310   :  { %2861 = vmatpush3.bf16.msra.mxu1 %v3263_v62  ;;  %v1143_v62 = vrot.slane %v1138_v60, %v1142_v58 }
 0x311   :  { %2883 = vmatpush3.bf16.msra.mxu0 %v3265_v47  ;;  %2862 = vmatprep.subr.bf16.mxu1 %v3266_v63  ;;  %v1147_v47 = vrot.slane %v1138_v60, %v1146_v61 }
 0x312   :  { %2884 = vmatprep.subr.bf16.mxu0 %v3268_v1 }
 0x314   :  { %2863 = vmatpush3.bf16.msra.mxu1 %v3267_v50 }
 0x315   :  { %2885 = vmatpush3.bf16.msra.mxu0 %v3269_v2  ;;  %2864 = vmatprep.subr.bf16.mxu1 %v3270_v45 }
 0x316   :  { %2886 = vmatprep.subr.bf16.mxu0 %v3272_v44 }
 0x318   :  { %2865 = vmatpush3.bf16.msra.mxu1 %v3271_v3 }
 0x319   :  { %2887 = vmatpush3.bf16.msra.mxu0 %v3273_v25  ;;  %2866 = vmatprep.subr.bf16.mxu1 %v3274_v49 }
 0x31a   :  { %2888 = vmatprep.subr.bf16.mxu0 %v3276_v48 }
 0x31c   :  { %2867 = vmatpush3.bf16.msra.mxu1 %v3275_v0 }
 0x31d   :  { %2889 = vmatpush3.bf16.msra.mxu0 %v3277_v4  ;;  %2868 = vmatprep.subr.bf16.mxu1 %v3278_v5 }
 0x31e   :  { %2890 = vmatprep.subr.bf16.mxu0 %v3280_v6 }
 0x320   :  { %2869 = vmatpush3.bf16.msra.mxu1 %v3279_v7 }
 0x321   :  { %2891 = vmatpush3.bf16.msra.mxu0 %v3281_v8  ;;  %2870 = vmatprep.subr.bf16.mxu1 %v3282_v9 }
 0x322   :  { %2892 = vmatprep.subr.bf16.mxu0 %v3284_v10 }
 0x324   :  { %2871 = vmatpush3.bf16.msra.mxu1 %v3283_v11 }
 0x325   :  { %2893 = vmatpush3.bf16.msra.mxu0 %v3285_v12  ;;  %2872 = vmatprep.subr.bf16.mxu1 %v3286_v13 }
 0x326   :  { %2894 = vmatprep.subr.bf16.mxu0 %v3288_v14 }
 0x328   :  { %2873 = vmatpush3.bf16.msra.mxu1 %v3287_v15 }
 0x329   :  { %2895 = vmatpush3.bf16.msra.mxu0 %v3289_v16  ;;  %2902 = vmatprep.subr.bf16.mxu1 %v3290_v17 }
 0x32a   :  { %2924 = vmatprep.subr.bf16.mxu0 %v3292_v18 }
 0x32b   :  { %2376 = vmatmul.mubr.bf16.vlgmr.msra.gmra.mxu1 %v3621_v33  ;;  %v3301_v33 = vld [vmem:[#allocation9 + $0x500] ss:$12 sps:$4 sm:$0xff]  }
 0x32c   :  { %2416 = vmatmul.mubr.bf16.vlgmr.msra.gmra.mxu0 %v3625_v36  ;;  %2903 = vmatpush3.bf16.msra.mxu1 %v3291_v19  ;;  %v3304_v36 = vld [vmem:[#allocation9 + $0x5a8] ss:$12 sps:$4 sm:$0xff]  }
 0x32d   :  { %2455 = vmatprep.mubr.bf16.mxu1 %v3628_v38  ;;  %2925 = vmatpush3.bf16.msra.mxu0 %v3293_v20  ;;  %v3305_v38 = vld [vmem:[#allocation9 + $0x4e8] ss:$12 sps:$4 sm:$0xff]  }
 0x32e   :  { %2495 = vmatprep.mubr.bf16.mxu0 %v3640_v40  ;;  %2904 = vmatprep.subr.bf16.mxu1 %v3294_v21  ;;  %v3307_v40 = vld [vmem:[#allocation9 + $0x350] ss:$12 sps:$4 sm:$0xff]  }
 0x32f   :  { %2926 = vmatprep.subr.bf16.mxu0 %v3296_v41 }
 0x330   :  { %2905 = vmatpush3.bf16.msra.mxu1 %v3295_v22 }
 0x331   :  { %2927 = vmatpush3.bf16.msra.mxu0 %v3297_v23  ;;  %2906 = vmatprep.subr.bf16.mxu1 %v3298_v24  ;;  %v1150_v23 = vsub.s32 2, %v3522_v34 }
 0x332   :  { %2928 = vmatprep.subr.bf16.mxu0 %v3300_v26 }
 0x333   :  { %v1151_v24 = vrot.slane %v1138_v60, %v1150_v23 }
 0x334   :  { %2907 = vmatpush3.bf16.msra.mxu1 %v3299_v46  ;;  %v3443_v46 = vmov 1983009808  }
 0x335   :  { %2929 = vmatpush3.bf16.msra.mxu0 %v3301_v33  ;;  %2908 = vmatprep.subr.bf16.mxu1 %v3302_v27  ;;  %v2508_v33 = vunpack.c.l.s4 %v3443_v46 }
 0x336   :  { %2930 = vmatprep.subr.bf16.mxu0 %v3304_v36 }
 0x338   :  { %2909 = vmatpush3.bf16.msra.mxu1 %v3303_v28 }
 0x339   :  { %2931 = vmatpush3.bf16.msra.mxu0 %v3305_v38  ;;  %2910 = vmatprep.subr.bf16.mxu1 %v3306_v29  ;;  %v2509_v38 = vunpack.c.0.s8 %v2508_v33 }
 0x33a   :  { %2932 = vmatprep.subr.bf16.mxu0 %v3308_v30 }
 0x33c   :  { %2911 = vmatpush3.bf16.msra.mxu1 %v3307_v40 }
 0x33d   :  { %2933 = vmatpush3.bf16.msra.mxu0 %v3309_v31  ;;  %2912 = vmatprep.subr.bf16.mxu1 %v3310_v32 }
 0x33e   :  { %2934 = vmatprep.subr.bf16.mxu0 %v3312_v35 }
 0x340   :  { %2913 = vmatpush3.bf16.msra.mxu1 %v3311_v37 }
 0x341   :  { %2935 = vmatpush3.bf16.msra.mxu0 %v3313_v39  ;;  %2914 = vmatprep.subr.bf16.mxu1 %v3314_v42  ;;  %v2512_v39 = vsub.s32 %v2509_v38, %v3522_v34 }
 0x342   :  { %2936 = vmatprep.subr.bf16.mxu0 %v3316_v51 }
 0x344   :  { %2915 = vmatpush3.bf16.msra.mxu1 %v3315_v52 }
 0x345   :  { %2937 = vmatpush3.bf16.msra.mxu0 %v3317_v43  ;;  %2916 = vmatprep.subr.bf16.mxu1 %v3318_v53 }
 0x346   :  { %2938 = vmatprep.subr.bf16.mxu0 %v3320_v54 }
 0x348   :  { %2917 = vmatpush3.bf16.msra.mxu1 %v3319_v55 }
 0x349   :  { %2939 = vmatpush3.bf16.msra.mxu0 %v3321_v56 }
 0x34b   :  { %2456 = vmatmul.mubr.bf16.vlgmr.msra.gmra.mxu1 %v3646_v57 }
 0x34c   :  { %2496 = vmatmul.mubr.bf16.vlgmr.msra.gmra.mxu0 %v3650_v59 }
 0x38b   :  { %v2213_v63 = vpop.f32.mrf.mxu1 }
 0x38c   :  { %v2214_v1 = vadd.f32 %v2213_v63, %v1143_v62  ;;  %v2254_v50 = vpop.f32.mrf.mxu0 }
 0x38d   :  { %v2215_v2 = vpop.f32.mrf.mxu1 }
 0x38e   :  { %v2255_v45 = vadd.f32 %v2254_v50, %v2214_v1  ;;  %v2216_v44 = vadd.f32 %v2215_v2, %v1147_v47  ;;  %v2256_v3 = vpop.f32.mrf.mxu0 }
 0x38f   :  { %v2217_v57 = vpop.f32.mrf.mxu1 }
 0x390   :  { %v2257_v25 = vadd.f32 %v2256_v3, %v2216_v44  ;;  %v2258_v59 = vpop.f32.mrf.mxu0 }
 0x391   :  { %v2218_v49 = vpop.f32.mrf.mxu1 }
 0x392   :  { %v2259_v48 = vpop.f32.mrf.mxu0 }
 0x3cb   :  { %v2295_v0 = vpop.f32.mrf.mxu1 }
 0x3cc   :  { %v2296_v4 = vadd.f32 %v2295_v0, %v2255_v45  ;;  %v2336_v5 = vpop.f32.mrf.mxu0 }
 0x3cd   :  { %v2297_v6 = vpop.f32.mrf.mxu1 }
 0x3ce   :  { %v2337_v7 = vadd.f32 %v2336_v5, %v2296_v4  ;;  %v2298_v8 = vadd.f32 %v2297_v6, %v2257_v25  ;;  %v2338_v9 = vpop.f32.mrf.mxu0 }
 0x3cf   :  { %v2299_v10 = vpop.f32.mrf.mxu1 }
 0x3d0   :  { %v2339_v11 = vadd.f32 %v2338_v9, %v2298_v8  ;;  %v2340_v12 = vpop.f32.mrf.mxu0 }
 0x3d1   :  { %v2300_v13 = vpop.f32.mrf.mxu1 }
 0x3d2   :  { %v2506_v14 = vcombine.low %v2337_v7, %v2339_v11  ;;  %v2341_v15 = vpop.f32.mrf.mxu0 }
 0x3d4   :  { %v2513_v54 = vrot.slane %v2506_v14, %v2512_v39 }
 0x3eb   :  { %v2874_v16 = vpop.f32.mrf.mxu1 }
 0x3ec   :  { %v2896_v17 = vpop.f32.mrf.mxu0 }
 0x3ed   :  { %v2875_v18 = vpop.f32.mrf.mxu1 }
 0x3ee   :  { %v2897_v19 = vpop.f32.mrf.mxu0  ;;  %v2876_v26 = vadd.f32 %v2875_v18, %v2874_v16 }
 0x3ef   :  { %v2877_v20 = vpop.f32.mrf.mxu1  ;;  %v2898_v36 = vadd.f32 %v2897_v19, %v2896_v17 }
 0x3f0   :  { %v2899_v21 = vpop.f32.mrf.mxu0  ;;  %v2378_v27 = vadd.f32 %v2876_v26, %v1151_v24 }
 0x3f1   :  { %v2878_v41 = vpop.f32.mrf.mxu1 }
 0x3f2   :  { %v2900_v22 = vpop.f32.mrf.mxu0  ;;  %v2418_v40 = vadd.f32 %v2898_v36, %v2378_v27 }
 0x40b   :  { %v2918_v28 = vpop.f32.mrf.mxu1 }
 0x40c   :  { %v2940_v29 = vpop.f32.mrf.mxu0 }
 0x40d   :  { %v2919_v30 = vpop.f32.mrf.mxu1 }
 0x40e   :  { %v2920_v31 = vadd.f32 %v2919_v30, %v2918_v28  ;;  %v2941_v32 = vpop.f32.mrf.mxu0 }
 0x40f   :  { %v2942_v35 = vadd.f32 %v2941_v32, %v2940_v29  ;;  %v2921_v37 = vpop.f32.mrf.mxu1 }
 0x410   :  { %v2458_v42 = vadd.f32 %v2920_v31, %v2418_v40  ;;  %v2943_v51 = vpop.f32.mrf.mxu0 }
 0x411   :  { %v2922_v52 = vpop.f32.mrf.mxu1 }
 0x412   :  { %v2498_v43 = vadd.f32 %v2942_v35, %v2458_v42  ;;  %v2944_v53 = vpop.f32.mrf.mxu0 }
 0x414   :  { %v2520_v55 = vrot.slane %v2498_v43, %v2512_v39 }
 0x416   :  { %v2521_v56 = vcombine.low %v2513_v54, %v2520_v55 }
 0x418   :  { %2523 = vst [vmem:[%s3679_s7] sm:$0x3f] %v2521_v56 }
 0x419   :  { %2528 = vsyncpa [#allocation3], 1 }
 0x41a   :  { %2529 = vsyncpa [#allocation5], 1 }
 0x41b   :  { %2530 = vsyncpa [#allocation8], 1 }

</bundles_post_ra>
